<compile_context>
chip_gen: v5e
topology: v5e:2x2
jax: 0.10.0
libtpu: 0.0.40
codegen_flags: <defaults>
</compile_context>

<pallas_src>
import numpy as np
import jax
import jax.numpy as jnp
from jax.experimental import pallas as pl
from jax.experimental.pallas import tpu as pltpu


# ------------------------------- fused kernel --------------------------------

def _make_fused_kernel(n_ch, n_frames, n_fft, hop, n_bins, f_pad):
    """Fused framing + DFT + cross-spectra kernel, specialized to static sizes.

    Refs:
      x_ref:     (1, C, L_pad)     reflect-padded signals, one batch element
      basis_ref: (2*f_pad, n_fft)  transposed fused DFT basis:
                                   rows [0, F)            =  cos(2*pi*k*n/N)
                                   rows [f_pad, f_pad+F)  = -sin(2*pi*k*n/N)
      ore_ref:   (1, P, F, T)      real part of all channel-pair cross spectra
      oim_ref:   (1, P, F, T)      imag part
    """
    def kernel(x_ref, basis_ref, ore_ref, oim_ref):
        basis_t = basis_ref[...]                               # (2*f_pad, n_fft)

        s_re, s_im = [], []
        for c in range(n_ch):
            xc = x_ref[0, c:c + 1, :]                          # (1, L_pad)
            # In-kernel framing: T static slices of the padded signal (no 4x
            # frames intermediate in HBM).
            frames_c = jnp.concatenate(
                [xc[:, t * hop:t * hop + n_fft] for t in range(n_frames)],
                axis=0)                                        # (T, n_fft)
            # One MXU matmul per channel; the result is already in the final
            # (freq, time) orientation, the frames transpose folds into the
            # MXU feed (same pattern as attention's q @ k.T).
            spec_t = jnp.dot(basis_t, frames_c.T,
                             preferred_element_type=jnp.float32)  # (2*f_pad, T)
            s_re.append(spec_t[:n_bins, :])                    # (F, T)
            s_im.append(spec_t[f_pad:f_pad + n_bins, :])       # (F, T)
        s_re = jnp.stack(s_re, axis=0)                         # (C, F, T)
        s_im = jnp.stack(s_im, axis=0)

        # a * conj(b) for all pairs (c1, c2 >= c1).  The c2 loop is vectorized
        # into one slab product + one store per c1.
        p0 = 0
        for c1 in range(n_ch):
            n_rest = n_ch - c1
            ar = s_re[c1:c1 + 1]                               # (1, F, T)
            ai = s_im[c1:c1 + 1]
            br = s_re[c1:]                                     # (n_rest, F, T)
            bi = s_im[c1:]
            ore_ref[0, p0:p0 + n_rest] = ar * br + ai * bi
            oim_ref[0, p0:p0 + n_rest] = ai * br - ar * bi
            p0 += n_rest
    return kernel


# ------------------------------ module forward -------------------------------

def cross_spectra_forward(X, n_fft, onesided=True):
    """JAX/Pallas equivalent of CrossSpectra.forward -> (B, P, F, T) complex64."""
    B, C, L = X.shape
    hop = n_fft // 4                  # torch.stft default hop_length
    pad = n_fft // 2                  # torch.stft center=True padding

    # Reflect padding stays in XLA (tiny); framing happens inside the kernel.
    x_pad = jnp.pad(X.astype(jnp.float32), ((0, 0), (0, 0), (pad, pad)),
                    mode="reflect")
    L_pad = L + 2 * pad
    T = 1 + (L_pad - n_fft) // hop

    n_bins_full = n_fft // 2 + 1 if onesided else n_fft
    F = n_bins_full - 1               # StftArray drops bin 0
    F_pad = ((F + 127) // 128) * 128  # vreg-aligned real/imag halves
    n_pairs = C * (C + 1) // 2

    # Transposed fused DFT basis [cos ; 0 ; -sin ; 0] for bins 1..F, f32.
    # TODO(synk): cast basis/frames to bf16 on v6e/v7x if the accuracy budget
    # allows (halves MXU input bytes); kept f32 here for exactness.
    k = np.arange(1, F + 1)
    n = np.arange(n_fft)
    ang = 2.0 * np.pi * np.outer(k, n) / n_fft                 # (F, n_fft)
    basis_t = np.zeros((2 * F_pad, n_fft), dtype=np.float32)
    basis_t[:F, :] = np.cos(ang)
    basis_t[F_pad:F_pad + F, :] = -np.sin(ang)
    basis_t = jnp.asarray(basis_t)

    # TODO(synk): for large C or very long signals, add a grid axis tiling the
    # frame/pair axes so the per-batch block stays inside v7x's 64 MiB VMEM;
    # for n_fft >= 2048, K-tile the DFT matmul with a VMEM accumulator.
    # TODO(synk): if B == 1, split the grid over pairs or frames instead so
    # both v7x TensorCores stay busy.
    block_bytes = 4 * (C * L_pad                 # signal block
                       + 2 * F_pad * n_fft       # basis block
                       + 2 * n_pairs * F * T     # two output blocks
                       + C * (T * n_fft + 2 * F_pad * T + 2 * F * T))  # temps
    vmem_limit = int(min(max(4 * block_bytes, 16 * 1024 * 1024),
                         48 * 1024 * 1024))

    kernel = _make_fused_kernel(C, T, n_fft, hop, F, F_pad)
    cre, cim = pl.pallas_call(
        kernel,
        out_shape=(jax.ShapeDtypeStruct((B, n_pairs, F, T), jnp.float32),
                   jax.ShapeDtypeStruct((B, n_pairs, F, T), jnp.float32)),
        grid_spec=pltpu.PrefetchScalarGridSpec(
            num_scalar_prefetch=0,
            grid=(B,),
            in_specs=[pl.BlockSpec((1, C, L_pad), lambda b: (b, 0, 0)),
                      pl.BlockSpec((2 * F_pad, n_fft), lambda b: (0, 0))],
            out_specs=(pl.BlockSpec((1, n_pairs, F, T),
                                    lambda b: (b, 0, 0, 0)),
                       pl.BlockSpec((1, n_pairs, F, T),
                                    lambda b: (b, 0, 0, 0)))),
        compiler_params=pltpu.CompilerParams(
            dimension_semantics=("parallel",),
            vmem_limit_bytes=vmem_limit),
    )(x_pad, basis_t)

    # Only XLA epilogue: form the complex64 result (the kernel already wrote
    # the final (B, P, F, T) layout).
    return jax.lax.complex(cre, cim)


# ---------------- pure-JAX reference (verification only) ----------------

def cross_spectra_reference(X, n_fft, onesided=True):
    B, C, _ = X.shape
    hop = n_fft // 4
    pad = n_fft // 2
    x_pad = jnp.pad(X, ((0, 0), (0, 0), (pad, pad)), mode="reflect")
    num_frames = 1 + (x_pad.shape[-1] - n_fft) // hop
    idx = jnp.arange(num_frames)[:, None] * hop + jnp.arange(n_fft)[None, :]
    frames = x_pad[:, :, idx].astype(jnp.float32)             # (B, C, T, n_fft)
    if onesided:
        spec = jnp.fft.rfft(frames, axis=-1)[..., 1:]
    else:
        spec = jnp.fft.fft(frames, axis=-1)[..., 1:]
    spec = jnp.transpose(spec, (0, 1, 3, 2))                  # (B, C, F, T)
    outs = []
    for c1 in range(C):
        for c2 in range(c1, C):
            outs.append(spec[:, c1] * jnp.conj(spec[:, c2]))
    return jnp.stack(outs, axis=1)


if __name__ == "__main__":
    # model_config = {'n_fft': 64, 'use_onesided_fft': True}
    n_fft = 64
    batch, n_channels, time_steps = 2, 4, 240
    key = jax.random.PRNGKey(0)
    X = jax.random.normal(key, (batch, n_channels, time_steps),
                          dtype=jnp.float32)

    fwd = jax.jit(lambda x: cross_spectra_forward(x, n_fft, onesided=True))
    out = jax.block_until_ready(fwd(X))

    n_pairs = n_channels * (n_channels + 1) // 2
    num_frames = 1 + time_steps // (n_fft // 4)
    assert out.shape == (batch, n_pairs, n_fft // 2, num_frames), out.shape
    assert out.dtype == jnp.complex64

    ref = cross_spectra_reference(X, n_fft, onesided=True)
    np.testing.assert_allclose(np.asarray(out), np.asarray(ref),
                               rtol=2e-3, atol=2e-2)
    print("KERNEL_OK")
</pallas_src>

<mosaic_0001>
module attributes {stable_mosaic.version = 11 : i64} {
  func.func @kernel(%arg0: i32, %arg1: memref<1x4x304xf32, #tpu.memory_space<vmem>>, %arg2: memref<256x64xf32, #tpu.memory_space<vmem>>, %arg3: memref<1x10x32x16xf32, #tpu.memory_space<vmem>>, %arg4: memref<1x10x32x16xf32, #tpu.memory_space<vmem>>) attributes {dimension_semantics = [#tpu.dimension_semantics<parallel>], iteration_bounds = array<i64: 2>, scalar_prefetch = 0 : i64, scratch_operands = 0 : i64, tpu.core_type = #tpu.core_type<tc>, window_params = [{transform_indices = @transform_0, window_bounds = array<i64: 1, 4, 304>}, {pipeline_mode = #tpu.pipeline_mode<synchronous>, transform_indices = @transform_1, window_bounds = array<i64: 256, 64>}, {transform_indices = @transform_2, window_bounds = array<i64: 1, 10, 32, 16>}, {transform_indices = @transform_3, window_bounds = array<i64: 1, 10, 32, 16>}]} {
    %c0 = arith.constant 0 : index
    %c0_0 = arith.constant 0 : index
    %0 = vector.load %arg2[%c0, %c0_0] : memref<256x64xf32, #tpu.memory_space<vmem>>, vector<256x64xf32>
    %c0_1 = arith.constant 0 : index
    %c0_2 = arith.constant 0 : index
    %c0_3 = arith.constant 0 : index
    %1 = vector.load %arg1[%c0_1, %c0_2, %c0_3] : memref<1x4x304xf32, #tpu.memory_space<vmem>>, vector<1x1x304xf32>
    %2 = vector.shape_cast %1 : vector<1x1x304xf32> to vector<1x304xf32>
    %3 = vector.extract_strided_slice %2 {offsets = [0, 0], sizes = [1, 64], strides = [1, 1]} : vector<1x304xf32> to vector<1x64xf32>
    %4 = vector.extract_strided_slice %2 {offsets = [0, 16], sizes = [1, 64], strides = [1, 1]} : vector<1x304xf32> to vector<1x64xf32>
    %5 = vector.extract_strided_slice %2 {offsets = [0, 32], sizes = [1, 64], strides = [1, 1]} : vector<1x304xf32> to vector<1x64xf32>
    %6 = vector.extract_strided_slice %2 {offsets = [0, 48], sizes = [1, 64], strides = [1, 1]} : vector<1x304xf32> to vector<1x64xf32>
    %7 = vector.extract_strided_slice %2 {offsets = [0, 64], sizes = [1, 64], strides = [1, 1]} : vector<1x304xf32> to vector<1x64xf32>
    %8 = vector.extract_strided_slice %2 {offsets = [0, 80], sizes = [1, 64], strides = [1, 1]} : vector<1x304xf32> to vector<1x64xf32>
    %9 = vector.extract_strided_slice %2 {offsets = [0, 96], sizes = [1, 64], strides = [1, 1]} : vector<1x304xf32> to vector<1x64xf32>
    %10 = vector.extract_strided_slice %2 {offsets = [0, 112], sizes = [1, 64], strides = [1, 1]} : vector<1x304xf32> to vector<1x64xf32>
    %11 = vector.extract_strided_slice %2 {offsets = [0, 128], sizes = [1, 64], strides = [1, 1]} : vector<1x304xf32> to vector<1x64xf32>
    %12 = vector.extract_strided_slice %2 {offsets = [0, 144], sizes = [1, 64], strides = [1, 1]} : vector<1x304xf32> to vector<1x64xf32>
    %13 = vector.extract_strided_slice %2 {offsets = [0, 160], sizes = [1, 64], strides = [1, 1]} : vector<1x304xf32> to vector<1x64xf32>
    %14 = vector.extract_strided_slice %2 {offsets = [0, 176], sizes = [1, 64], strides = [1, 1]} : vector<1x304xf32> to vector<1x64xf32>
    %15 = vector.extract_strided_slice %2 {offsets = [0, 192], sizes = [1, 64], strides = [1, 1]} : vector<1x304xf32> to vector<1x64xf32>
    %16 = vector.extract_strided_slice %2 {offsets = [0, 208], sizes = [1, 64], strides = [1, 1]} : vector<1x304xf32> to vector<1x64xf32>
    %17 = vector.extract_strided_slice %2 {offsets = [0, 224], sizes = [1, 64], strides = [1, 1]} : vector<1x304xf32> to vector<1x64xf32>
    %18 = vector.extract_strided_slice %2 {offsets = [0, 240], sizes = [1, 64], strides = [1, 1]} : vector<1x304xf32> to vector<1x64xf32>
    %19 = tpu.concatenate %3, %4, %5, %6, %7, %8, %9, %10, %11, %12, %13, %14, %15, %16, %17, %18 in 0 : vector<1x64xf32>, vector<1x64xf32>, vector<1x64xf32>, vector<1x64xf32>, vector<1x64xf32>, vector<1x64xf32>, vector<1x64xf32>, vector<1x64xf32>, vector<1x64xf32>, vector<1x64xf32>, vector<1x64xf32>, vector<1x64xf32>, vector<1x64xf32>, vector<1x64xf32>, vector<1x64xf32>, vector<1x64xf32> -> vector<16x64xf32>
    %20 = tpu.transpose %19, [1, 0] : vector<16x64xf32> -> vector<64x16xf32>
    %cst = arith.constant dense<0.000000e+00> : vector<256x16xf32>
    %21 = tpu.matmul %0, %20, %cst {dimension_numbers = #tpu.dot_dimension_numbers<[1], [0], [0], [1], [0, 0, 1, 1], [], []>} : vector<256x64xf32>, vector<64x16xf32>, vector<256x16xf32> -> vector<256x16xf32>
    %22 = vector.extract_strided_slice %21 {offsets = [0, 0], sizes = [32, 16], strides = [1, 1]} : vector<256x16xf32> to vector<32x16xf32>
    %23 = vector.extract_strided_slice %21 {offsets = [128, 0], sizes = [32, 16], strides = [1, 1]} : vector<256x16xf32> to vector<32x16xf32>
    %c0_4 = arith.constant 0 : index
    %c1 = arith.constant 1 : index
    %c0_5 = arith.constant 0 : index
    %24 = vector.load %arg1[%c0_4, %c1, %c0_5] : memref<1x4x304xf32, #tpu.memory_space<vmem>>, vector<1x1x304xf32>
    %25 = vector.shape_cast %24 : vector<1x1x304xf32> to vector<1x304xf32>
    %26 = vector.extract_strided_slice %25 {offsets = [0, 0], sizes = [1, 64], strides = [1, 1]} : vector<1x304xf32> to vector<1x64xf32>
    %27 = vector.extract_strided_slice %25 {offsets = [0, 16], sizes = [1, 64], strides = [1, 1]} : vector<1x304xf32> to vector<1x64xf32>
    %28 = vector.extract_strided_slice %25 {offsets = [0, 32], sizes = [1, 64], strides = [1, 1]} : vector<1x304xf32> to vector<1x64xf32>
    %29 = vector.extract_strided_slice %25 {offsets = [0, 48], sizes = [1, 64], strides = [1, 1]} : vector<1x304xf32> to vector<1x64xf32>
    %30 = vector.extract_strided_slice %25 {offsets = [0, 64], sizes = [1, 64], strides = [1, 1]} : vector<1x304xf32> to vector<1x64xf32>
    %31 = vector.extract_strided_slice %25 {offsets = [0, 80], sizes = [1, 64], strides = [1, 1]} : vector<1x304xf32> to vector<1x64xf32>
    %32 = vector.extract_strided_slice %25 {offsets = [0, 96], sizes = [1, 64], strides = [1, 1]} : vector<1x304xf32> to vector<1x64xf32>
    %33 = vector.extract_strided_slice %25 {offsets = [0, 112], sizes = [1, 64], strides = [1, 1]} : vector<1x304xf32> to vector<1x64xf32>
    %34 = vector.extract_strided_slice %25 {offsets = [0, 128], sizes = [1, 64], strides = [1, 1]} : vector<1x304xf32> to vector<1x64xf32>
    %35 = vector.extract_strided_slice %25 {offsets = [0, 144], sizes = [1, 64], strides = [1, 1]} : vector<1x304xf32> to vector<1x64xf32>
    %36 = vector.extract_strided_slice %25 {offsets = [0, 160], sizes = [1, 64], strides = [1, 1]} : vector<1x304xf32> to vector<1x64xf32>
    %37 = vector.extract_strided_slice %25 {offsets = [0, 176], sizes = [1, 64], strides = [1, 1]} : vector<1x304xf32> to vector<1x64xf32>
    %38 = vector.extract_strided_slice %25 {offsets = [0, 192], sizes = [1, 64], strides = [1, 1]} : vector<1x304xf32> to vector<1x64xf32>
    %39 = vector.extract_strided_slice %25 {offsets = [0, 208], sizes = [1, 64], strides = [1, 1]} : vector<1x304xf32> to vector<1x64xf32>
    %40 = vector.extract_strided_slice %25 {offsets = [0, 224], sizes = [1, 64], strides = [1, 1]} : vector<1x304xf32> to vector<1x64xf32>
    %41 = vector.extract_strided_slice %25 {offsets = [0, 240], sizes = [1, 64], strides = [1, 1]} : vector<1x304xf32> to vector<1x64xf32>
    %42 = tpu.concatenate %26, %27, %28, %29, %30, %31, %32, %33, %34, %35, %36, %37, %38, %39, %40, %41 in 0 : vector<1x64xf32>, vector<1x64xf32>, vector<1x64xf32>, vector<1x64xf32>, vector<1x64xf32>, vector<1x64xf32>, vector<1x64xf32>, vector<1x64xf32>, vector<1x64xf32>, vector<1x64xf32>, vector<1x64xf32>, vector<1x64xf32>, vector<1x64xf32>, vector<1x64xf32>, vector<1x64xf32>, vector<1x64xf32> -> vector<16x64xf32>
    %43 = tpu.transpose %42, [1, 0] : vector<16x64xf32> -> vector<64x16xf32>
    %cst_6 = arith.constant dense<0.000000e+00> : vector<256x16xf32>
    %44 = tpu.matmul %0, %43, %cst_6 {dimension_numbers = #tpu.dot_dimension_numbers<[1], [0], [0], [1], [0, 0, 1, 1], [], []>} : vector<256x64xf32>, vector<64x16xf32>, vector<256x16xf32> -> vector<256x16xf32>
    %45 = vector.extract_strided_slice %44 {offsets = [0, 0], sizes = [32, 16], strides = [1, 1]} : vector<256x16xf32> to vector<32x16xf32>
    %46 = vector.extract_strided_slice %44 {offsets = [128, 0], sizes = [32, 16], strides = [1, 1]} : vector<256x16xf32> to vector<32x16xf32>
    %c0_7 = arith.constant 0 : index
    %c2 = arith.constant 2 : index
    %c0_8 = arith.constant 0 : index
    %47 = vector.load %arg1[%c0_7, %c2, %c0_8] : memref<1x4x304xf32, #tpu.memory_space<vmem>>, vector<1x1x304xf32>
    %48 = vector.shape_cast %47 : vector<1x1x304xf32> to vector<1x304xf32>
    %49 = vector.extract_strided_slice %48 {offsets = [0, 0], sizes = [1, 64], strides = [1, 1]} : vector<1x304xf32> to vector<1x64xf32>
    %50 = vector.extract_strided_slice %48 {offsets = [0, 16], sizes = [1, 64], strides = [1, 1]} : vector<1x304xf32> to vector<1x64xf32>
    %51 = vector.extract_strided_slice %48 {offsets = [0, 32], sizes = [1, 64], strides = [1, 1]} : vector<1x304xf32> to vector<1x64xf32>
    %52 = vector.extract_strided_slice %48 {offsets = [0, 48], sizes = [1, 64], strides = [1, 1]} : vector<1x304xf32> to vector<1x64xf32>
    %53 = vector.extract_strided_slice %48 {offsets = [0, 64], sizes = [1, 64], strides = [1, 1]} : vector<1x304xf32> to vector<1x64xf32>
    %54 = vector.extract_strided_slice %48 {offsets = [0, 80], sizes = [1, 64], strides = [1, 1]} : vector<1x304xf32> to vector<1x64xf32>
    %55 = vector.extract_strided_slice %48 {offsets = [0, 96], sizes = [1, 64], strides = [1, 1]} : vector<1x304xf32> to vector<1x64xf32>
    %56 = vector.extract_strided_slice %48 {offsets = [0, 112], sizes = [1, 64], strides = [1, 1]} : vector<1x304xf32> to vector<1x64xf32>
    %57 = vector.extract_strided_slice %48 {offsets = [0, 128], sizes = [1, 64], strides = [1, 1]} : vector<1x304xf32> to vector<1x64xf32>
    %58 = vector.extract_strided_slice %48 {offsets = [0, 144], sizes = [1, 64], strides = [1, 1]} : vector<1x304xf32> to vector<1x64xf32>
    %59 = vector.extract_strided_slice %48 {offsets = [0, 160], sizes = [1, 64], strides = [1, 1]} : vector<1x304xf32> to vector<1x64xf32>
    %60 = vector.extract_strided_slice %48 {offsets = [0, 176], sizes = [1, 64], strides = [1, 1]} : vector<1x304xf32> to vector<1x64xf32>
    %61 = vector.extract_strided_slice %48 {offsets = [0, 192], sizes = [1, 64], strides = [1, 1]} : vector<1x304xf32> to vector<1x64xf32>
    %62 = vector.extract_strided_slice %48 {offsets = [0, 208], sizes = [1, 64], strides = [1, 1]} : vector<1x304xf32> to vector<1x64xf32>
    %63 = vector.extract_strided_slice %48 {offsets = [0, 224], sizes = [1, 64], strides = [1, 1]} : vector<1x304xf32> to vector<1x64xf32>
    %64 = vector.extract_strided_slice %48 {offsets = [0, 240], sizes = [1, 64], strides = [1, 1]} : vector<1x304xf32> to vector<1x64xf32>
    %65 = tpu.concatenate %49, %50, %51, %52, %53, %54, %55, %56, %57, %58, %59, %60, %61, %62, %63, %64 in 0 : vector<1x64xf32>, vector<1x64xf32>, vector<1x64xf32>, vector<1x64xf32>, vector<1x64xf32>, vector<1x64xf32>, vector<1x64xf32>, vector<1x64xf32>, vector<1x64xf32>, vector<1x64xf32>, vector<1x64xf32>, vector<1x64xf32>, vector<1x64xf32>, vector<1x64xf32>, vector<1x64xf32>, vector<1x64xf32> -> vector<16x64xf32>
    %66 = tpu.transpose %65, [1, 0] : vector<16x64xf32> -> vector<64x16xf32>
    %cst_9 = arith.constant dense<0.000000e+00> : vector<256x16xf32>
    %67 = tpu.matmul %0, %66, %cst_9 {dimension_numbers = #tpu.dot_dimension_numbers<[1], [0], [0], [1], [0, 0, 1, 1], [], []>} : vector<256x64xf32>, vector<64x16xf32>, vector<256x16xf32> -> vector<256x16xf32>
    %68 = vector.extract_strided_slice %67 {offsets = [0, 0], sizes = [32, 16], strides = [1, 1]} : vector<256x16xf32> to vector<32x16xf32>
    %69 = vector.extract_strided_slice %67 {offsets = [128, 0], sizes = [32, 16], strides = [1, 1]} : vector<256x16xf32> to vector<32x16xf32>
    %c0_10 = arith.constant 0 : index
    %c3 = arith.constant 3 : index
    %c0_11 = arith.constant 0 : index
    %70 = vector.load %arg1[%c0_10, %c3, %c0_11] : memref<1x4x304xf32, #tpu.memory_space<vmem>>, vector<1x1x304xf32>
    %71 = vector.shape_cast %70 : vector<1x1x304xf32> to vector<1x304xf32>
    %72 = vector.extract_strided_slice %71 {offsets = [0, 0], sizes = [1, 64], strides = [1, 1]} : vector<1x304xf32> to vector<1x64xf32>
    %73 = vector.extract_strided_slice %71 {offsets = [0, 16], sizes = [1, 64], strides = [1, 1]} : vector<1x304xf32> to vector<1x64xf32>
    %74 = vector.extract_strided_slice %71 {offsets = [0, 32], sizes = [1, 64], strides = [1, 1]} : vector<1x304xf32> to vector<1x64xf32>
    %75 = vector.extract_strided_slice %71 {offsets = [0, 48], sizes = [1, 64], strides = [1, 1]} : vector<1x304xf32> to vector<1x64xf32>
    %76 = vector.extract_strided_slice %71 {offsets = [0, 64], sizes = [1, 64], strides = [1, 1]} : vector<1x304xf32> to vector<1x64xf32>
    %77 = vector.extract_strided_slice %71 {offsets = [0, 80], sizes = [1, 64], strides = [1, 1]} : vector<1x304xf32> to vector<1x64xf32>
    %78 = vector.extract_strided_slice %71 {offsets = [0, 96], sizes = [1, 64], strides = [1, 1]} : vector<1x304xf32> to vector<1x64xf32>
    %79 = vector.extract_strided_slice %71 {offsets = [0, 112], sizes = [1, 64], strides = [1, 1]} : vector<1x304xf32> to vector<1x64xf32>
    %80 = vector.extract_strided_slice %71 {offsets = [0, 128], sizes = [1, 64], strides = [1, 1]} : vector<1x304xf32> to vector<1x64xf32>
    %81 = vector.extract_strided_slice %71 {offsets = [0, 144], sizes = [1, 64], strides = [1, 1]} : vector<1x304xf32> to vector<1x64xf32>
    %82 = vector.extract_strided_slice %71 {offsets = [0, 160], sizes = [1, 64], strides = [1, 1]} : vector<1x304xf32> to vector<1x64xf32>
    %83 = vector.extract_strided_slice %71 {offsets = [0, 176], sizes = [1, 64], strides = [1, 1]} : vector<1x304xf32> to vector<1x64xf32>
    %84 = vector.extract_strided_slice %71 {offsets = [0, 192], sizes = [1, 64], strides = [1, 1]} : vector<1x304xf32> to vector<1x64xf32>
    %85 = vector.extract_strided_slice %71 {offsets = [0, 208], sizes = [1, 64], strides = [1, 1]} : vector<1x304xf32> to vector<1x64xf32>
    %86 = vector.extract_strided_slice %71 {offsets = [0, 224], sizes = [1, 64], strides = [1, 1]} : vector<1x304xf32> to vector<1x64xf32>
    %87 = vector.extract_strided_slice %71 {offsets = [0, 240], sizes = [1, 64], strides = [1, 1]} : vector<1x304xf32> to vector<1x64xf32>
    %88 = tpu.concatenate %72, %73, %74, %75, %76, %77, %78, %79, %80, %81, %82, %83, %84, %85, %86, %87 in 0 : vector<1x64xf32>, vector<1x64xf32>, vector<1x64xf32>, vector<1x64xf32>, vector<1x64xf32>, vector<1x64xf32>, vector<1x64xf32>, vector<1x64xf32>, vector<1x64xf32>, vector<1x64xf32>, vector<1x64xf32>, vector<1x64xf32>, vector<1x64xf32>, vector<1x64xf32>, vector<1x64xf32>, vector<1x64xf32> -> vector<16x64xf32>
    %89 = tpu.transpose %88, [1, 0] : vector<16x64xf32> -> vector<64x16xf32>
    %cst_12 = arith.constant dense<0.000000e+00> : vector<256x16xf32>
    %90 = tpu.matmul %0, %89, %cst_12 {dimension_numbers = #tpu.dot_dimension_numbers<[1], [0], [0], [1], [0, 0, 1, 1], [], []>} : vector<256x64xf32>, vector<64x16xf32>, vector<256x16xf32> -> vector<256x16xf32>
    %91 = vector.extract_strided_slice %90 {offsets = [0, 0], sizes = [32, 16], strides = [1, 1]} : vector<256x16xf32> to vector<32x16xf32>
    %92 = vector.extract_strided_slice %90 {offsets = [128, 0], sizes = [32, 16], strides = [1, 1]} : vector<256x16xf32> to vector<32x16xf32>
    %93 = vector.shape_cast %22 : vector<32x16xf32> to vector<1x32x16xf32>
    %94 = vector.shape_cast %45 : vector<32x16xf32> to vector<1x32x16xf32>
    %95 = vector.shape_cast %68 : vector<32x16xf32> to vector<1x32x16xf32>
    %96 = vector.shape_cast %91 : vector<32x16xf32> to vector<1x32x16xf32>
    %97 = tpu.concatenate %93, %94, %95, %96 in 0 : vector<1x32x16xf32>, vector<1x32x16xf32>, vector<1x32x16xf32>, vector<1x32x16xf32> -> vector<4x32x16xf32>
    %98 = vector.shape_cast %23 : vector<32x16xf32> to vector<1x32x16xf32>
    %99 = vector.shape_cast %46 : vector<32x16xf32> to vector<1x32x16xf32>
    %100 = vector.shape_cast %69 : vector<32x16xf32> to vector<1x32x16xf32>
    %101 = vector.shape_cast %92 : vector<32x16xf32> to vector<1x32x16xf32>
    %102 = tpu.concatenate %98, %99, %100, %101 in 0 : vector<1x32x16xf32>, vector<1x32x16xf32>, vector<1x32x16xf32>, vector<1x32x16xf32> -> vector<4x32x16xf32>
    %103 = vector.extract_strided_slice %97 {offsets = [0, 0, 0], sizes = [1, 32, 16], strides = [1, 1, 1]} : vector<4x32x16xf32> to vector<1x32x16xf32>
    %104 = vector.extract_strided_slice %102 {offsets = [0, 0, 0], sizes = [1, 32, 16], strides = [1, 1, 1]} : vector<4x32x16xf32> to vector<1x32x16xf32>
    %105 = vector.broadcast %103 : vector<1x32x16xf32> to vector<4x32x16xf32>
    %106 = arith.mulf %105, %97 : vector<4x32x16xf32>
    %107 = vector.broadcast %104 : vector<1x32x16xf32> to vector<4x32x16xf32>
    %108 = arith.mulf %107, %102 : vector<4x32x16xf32>
    %109 = arith.addf %106, %108 : vector<4x32x16xf32>
    %c0_13 = arith.constant 0 : index
    %c0_14 = arith.constant 0 : index
    %c0_15 = arith.constant 0 : index
    %c0_16 = arith.constant 0 : index
    %110 = vector.load %arg3[%c0_13, %c0_14, %c0_15, %c0_16] : memref<1x10x32x16xf32, #tpu.memory_space<vmem>>, vector<1x4x32x16xf32>
    %111 = vector.shape_cast %110 : vector<1x4x32x16xf32> to vector<4x32x16xf32>
    %112 = vector.shape_cast %109 : vector<4x32x16xf32> to vector<1x4x32x16xf32>
    tpu.vector_store %arg3[%c0_13, %c0_14, %c0_15, %c0_16], %112 {strides = array<i32>} : memref<1x10x32x16xf32, #tpu.memory_space<vmem>>, vector<1x4x32x16xf32>,
    %113 = vector.broadcast %104 : vector<1x32x16xf32> to vector<4x32x16xf32>
    %114 = arith.mulf %113, %97 : vector<4x32x16xf32>
    %115 = vector.broadcast %103 : vector<1x32x16xf32> to vector<4x32x16xf32>
    %116 = arith.mulf %115, %102 : vector<4x32x16xf32>
    %117 = arith.subf %114, %116 : vector<4x32x16xf32>
    %c0_17 = arith.constant 0 : index
    %c0_18 = arith.constant 0 : index
    %c0_19 = arith.constant 0 : index
    %c0_20 = arith.constant 0 : index
    %118 = vector.load %arg4[%c0_17, %c0_18, %c0_19, %c0_20] : memref<1x10x32x16xf32, #tpu.memory_space<vmem>>, vector<1x4x32x16xf32>
    %119 = vector.shape_cast %118 : vector<1x4x32x16xf32> to vector<4x32x16xf32>
    %120 = vector.shape_cast %117 : vector<4x32x16xf32> to vector<1x4x32x16xf32>
    tpu.vector_store %arg4[%c0_17, %c0_18, %c0_19, %c0_20], %120 {strides = array<i32>} : memref<1x10x32x16xf32, #tpu.memory_space<vmem>>, vector<1x4x32x16xf32>,
    %121 = vector.extract_strided_slice %97 {offsets = [1, 0, 0], sizes = [1, 32, 16], strides = [1, 1, 1]} : vector<4x32x16xf32> to vector<1x32x16xf32>
    %122 = vector.extract_strided_slice %102 {offsets = [1, 0, 0], sizes = [1, 32, 16], strides = [1, 1, 1]} : vector<4x32x16xf32> to vector<1x32x16xf32>
    %123 = vector.extract_strided_slice %97 {offsets = [1, 0, 0], sizes = [3, 32, 16], strides = [1, 1, 1]} : vector<4x32x16xf32> to vector<3x32x16xf32>
    %124 = vector.extract_strided_slice %102 {offsets = [1, 0, 0], sizes = [3, 32, 16], strides = [1, 1, 1]} : vector<4x32x16xf32> to vector<3x32x16xf32>
    %125 = vector.broadcast %121 : vector<1x32x16xf32> to vector<3x32x16xf32>
    %126 = arith.mulf %125, %123 : vector<3x32x16xf32>
    %127 = vector.broadcast %122 : vector<1x32x16xf32> to vector<3x32x16xf32>
    %128 = arith.mulf %127, %124 : vector<3x32x16xf32>
    %129 = arith.addf %126, %128 : vector<3x32x16xf32>
    %c0_21 = arith.constant 0 : index
    %c4 = arith.constant 4 : index
    %c0_22 = arith.constant 0 : index
    %c0_23 = arith.constant 0 : index
    %130 = vector.load %arg3[%c0_21, %c4, %c0_22, %c0_23] : memref<1x10x32x16xf32, #tpu.memory_space<vmem>>, vector<1x3x32x16xf32>
    %131 = vector.shape_cast %130 : vector<1x3x32x16xf32> to vector<3x32x16xf32>
    %132 = vector.shape_cast %129 : vector<3x32x16xf32> to vector<1x3x32x16xf32>
    tpu.vector_store %arg3[%c0_21, %c4, %c0_22, %c0_23], %132 {strides = array<i32>} : memref<1x10x32x16xf32, #tpu.memory_space<vmem>>, vector<1x3x32x16xf32>,
    %133 = vector.broadcast %122 : vector<1x32x16xf32> to vector<3x32x16xf32>
    %134 = arith.mulf %133, %123 : vector<3x32x16xf32>
    %135 = vector.broadcast %121 : vector<1x32x16xf32> to vector<3x32x16xf32>
    %136 = arith.mulf %135, %124 : vector<3x32x16xf32>
    %137 = arith.subf %134, %136 : vector<3x32x16xf32>
    %c0_24 = arith.constant 0 : index
    %c4_25 = arith.constant 4 : index
    %c0_26 = arith.constant 0 : index
    %c0_27 = arith.constant 0 : index
    %138 = vector.load %arg4[%c0_24, %c4_25, %c0_26, %c0_27] : memref<1x10x32x16xf32, #tpu.memory_space<vmem>>, vector<1x3x32x16xf32>
    %139 = vector.shape_cast %138 : vector<1x3x32x16xf32> to vector<3x32x16xf32>
    %140 = vector.shape_cast %137 : vector<3x32x16xf32> to vector<1x3x32x16xf32>
    tpu.vector_store %arg4[%c0_24, %c4_25, %c0_26, %c0_27], %140 {strides = array<i32>} : memref<1x10x32x16xf32, #tpu.memory_space<vmem>>, vector<1x3x32x16xf32>,
    %141 = vector.extract_strided_slice %97 {offsets = [2, 0, 0], sizes = [1, 32, 16], strides = [1, 1, 1]} : vector<4x32x16xf32> to vector<1x32x16xf32>
    %142 = vector.extract_strided_slice %102 {offsets = [2, 0, 0], sizes = [1, 32, 16], strides = [1, 1, 1]} : vector<4x32x16xf32> to vector<1x32x16xf32>
    %143 = vector.extract_strided_slice %97 {offsets = [2, 0, 0], sizes = [2, 32, 16], strides = [1, 1, 1]} : vector<4x32x16xf32> to vector<2x32x16xf32>
    %144 = vector.extract_strided_slice %102 {offsets = [2, 0, 0], sizes = [2, 32, 16], strides = [1, 1, 1]} : vector<4x32x16xf32> to vector<2x32x16xf32>
    %145 = vector.broadcast %141 : vector<1x32x16xf32> to vector<2x32x16xf32>
    %146 = arith.mulf %145, %143 : vector<2x32x16xf32>
    %147 = vector.broadcast %142 : vector<1x32x16xf32> to vector<2x32x16xf32>
    %148 = arith.mulf %147, %144 : vector<2x32x16xf32>
    %149 = arith.addf %146, %148 : vector<2x32x16xf32>
    %c0_28 = arith.constant 0 : index
    %c7 = arith.constant 7 : index
    %c0_29 = arith.constant 0 : index
    %c0_30 = arith.constant 0 : index
    %150 = vector.load %arg3[%c0_28, %c7, %c0_29, %c0_30] : memref<1x10x32x16xf32, #tpu.memory_space<vmem>>, vector<1x2x32x16xf32>
    %151 = vector.shape_cast %150 : vector<1x2x32x16xf32> to vector<2x32x16xf32>
    %152 = vector.shape_cast %149 : vector<2x32x16xf32> to vector<1x2x32x16xf32>
    tpu.vector_store %arg3[%c0_28, %c7, %c0_29, %c0_30], %152 {strides = array<i32>} : memref<1x10x32x16xf32, #tpu.memory_space<vmem>>, vector<1x2x32x16xf32>,
    %153 = vector.broadcast %142 : vector<1x32x16xf32> to vector<2x32x16xf32>
    %154 = arith.mulf %153, %143 : vector<2x32x16xf32>
    %155 = vector.broadcast %141 : vector<1x32x16xf32> to vector<2x32x16xf32>
    %156 = arith.mulf %155, %144 : vector<2x32x16xf32>
    %157 = arith.subf %154, %156 : vector<2x32x16xf32>
    %c0_31 = arith.constant 0 : index
    %c7_32 = arith.constant 7 : index
    %c0_33 = arith.constant 0 : index
    %c0_34 = arith.constant 0 : index
    %158 = vector.load %arg4[%c0_31, %c7_32, %c0_33, %c0_34] : memref<1x10x32x16xf32, #tpu.memory_space<vmem>>, vector<1x2x32x16xf32>
    %159 = vector.shape_cast %158 : vector<1x2x32x16xf32> to vector<2x32x16xf32>
    %160 = vector.shape_cast %157 : vector<2x32x16xf32> to vector<1x2x32x16xf32>
    tpu.vector_store %arg4[%c0_31, %c7_32, %c0_33, %c0_34], %160 {strides = array<i32>} : memref<1x10x32x16xf32, #tpu.memory_space<vmem>>, vector<1x2x32x16xf32>,
    %161 = vector.extract_strided_slice %97 {offsets = [3, 0, 0], sizes = [1, 32, 16], strides = [1, 1, 1]} : vector<4x32x16xf32> to vector<1x32x16xf32>
    %162 = vector.extract_strided_slice %102 {offsets = [3, 0, 0], sizes = [1, 32, 16], strides = [1, 1, 1]} : vector<4x32x16xf32> to vector<1x32x16xf32>
    %163 = vector.extract_strided_slice %97 {offsets = [3, 0, 0], sizes = [1, 32, 16], strides = [1, 1, 1]} : vector<4x32x16xf32> to vector<1x32x16xf32>
    %164 = vector.extract_strided_slice %102 {offsets = [3, 0, 0], sizes = [1, 32, 16], strides = [1, 1, 1]} : vector<4x32x16xf32> to vector<1x32x16xf32>
    %165 = arith.mulf %161, %163 : vector<1x32x16xf32>
    %166 = arith.mulf %162, %164 : vector<1x32x16xf32>
    %167 = arith.addf %165, %166 : vector<1x32x16xf32>
    %c0_35 = arith.constant 0 : index
    %c9 = arith.constant 9 : index
    %c0_36 = arith.constant 0 : index
    %c0_37 = arith.constant 0 : index
    %168 = vector.load %arg3[%c0_35, %c9, %c0_36, %c0_37] : memref<1x10x32x16xf32, #tpu.memory_space<vmem>>, vector<1x1x32x16xf32>
    %169 = vector.shape_cast %168 : vector<1x1x32x16xf32> to vector<1x32x16xf32>
    %170 = vector.shape_cast %167 : vector<1x32x16xf32> to vector<1x1x32x16xf32>
    tpu.vector_store %arg3[%c0_35, %c9, %c0_36, %c0_37], %170 {strides = array<i32>} : memref<1x10x32x16xf32, #tpu.memory_space<vmem>>, vector<1x1x32x16xf32>,
    %171 = arith.mulf %162, %163 : vector<1x32x16xf32>
    %172 = arith.mulf %161, %164 : vector<1x32x16xf32>
    %173 = arith.subf %171, %172 : vector<1x32x16xf32>
    %c0_38 = arith.constant 0 : index
    %c9_39 = arith.constant 9 : index
    %c0_40 = arith.constant 0 : index
    %c0_41 = arith.constant 0 : index
    %174 = vector.load %arg4[%c0_38, %c9_39, %c0_40, %c0_41] : memref<1x10x32x16xf32, #tpu.memory_space<vmem>>, vector<1x1x32x16xf32>
    %175 = vector.shape_cast %174 : vector<1x1x32x16xf32> to vector<1x32x16xf32>
    %176 = vector.shape_cast %173 : vector<1x32x16xf32> to vector<1x1x32x16xf32>
    tpu.vector_store %arg4[%c0_38, %c9_39, %c0_40, %c0_41], %176 {strides = array<i32>} : memref<1x10x32x16xf32, #tpu.memory_space<vmem>>, vector<1x1x32x16xf32>,
    return
  }
  func.func @transform_0(%arg0: i32) -> (i32, i32, i32) {
    %c0_i32 = arith.constant 0 : i32
    %c0_i32_0 = arith.constant 0 : i32
    %c0_i32_1 = arith.constant 0 : i32
    return %arg0, %c0_i32, %c0_i32_0 : i32, i32, i32
  }
  func.func @transform_1(%arg0: i32) -> (i32, i32) {
    %c0_i32 = arith.constant 0 : i32
    %c0_i32_0 = arith.constant 0 : i32
    %c0_i32_1 = arith.constant 0 : i32
    return %c0_i32, %c0_i32_0 : i32, i32
  }
  func.func @transform_2(%arg0: i32) -> (i32, i32, i32, i32) {
    %c0_i32 = arith.constant 0 : i32
    %c0_i32_0 = arith.constant 0 : i32
    %c0_i32_1 = arith.constant 0 : i32
    %c0_i32_2 = arith.constant 0 : i32
    return %arg0, %c0_i32, %c0_i32_0, %c0_i32_1 : i32, i32, i32, i32
  }
  func.func @transform_3(%arg0: i32) -> (i32, i32, i32, i32) {
    %c0_i32 = arith.constant 0 : i32
    %c0_i32_0 = arith.constant 0 : i32
    %c0_i32_1 = arith.constant 0 : i32
    %c0_i32_2 = arith.constant 0 : i32
    return %arg0, %c0_i32, %c0_i32_0, %c0_i32_1 : i32, i32, i32, i32
  }
}

</mosaic_0001>

<bundles_post_ra>
// kernel: custom-call
= control target key start
LH: loop header
LB: loop body
LE: loop exit
PB: predicated region body
PF: predicated region fallthrough
CT: control target
= control target key end

     0   :  { %s2011_s0 = inlined_call_operand.vmem [shape: f32[2,10,32,16], index: 0, kind: input, shape index: {}]   ;;  %s2012_s2 = inlined_call_operand.vmem [shape: c64[2,10,32,16], index: 2, kind: output, shape index: {}]   ;;  %s2013_s1 = inlined_call_operand.vmem [shape: f32[2,10,32,16], index: 1, kind: input, shape index: {}]  }
   0x1   :  { %v4_v0 = vld [vmem:[%s2011_s0] sm:$0xff]  ;;  %v719_v1 = vld [vmem:[%s2011_s0 + $0x8] sm:$0xff]  ;;  %v721_v2 = vld [vmem:[%s2011_s0 + $0x10] sm:$0xff] }
   0x2   :  { %5 = vst [vmem:[%s2012_s2] sm:$0xff] %v4_v0  ;;  %v723_v3 = vld [vmem:[%s2011_s0 + $0x18] sm:$0xff]  ;;  %v725_v4 = vld [vmem:[%s2011_s0 + $0x20] sm:$0xff]  ;;  %v727_v5 = vld [vmem:[%s2011_s0 + $0x28] sm:$0xff] }
   0x3   :  { %720 = vst [vmem:[%s2012_s2 + $0x8] sm:$0xff] %v719_v1  ;;  %v729_v6 = vld [vmem:[%s2011_s0 + $0x30] sm:$0xff]  ;;  %v731_v7 = vld [vmem:[%s2011_s0 + $0x38] sm:$0xff]  ;;  %v733_v8 = vld [vmem:[%s2011_s0 + $0x40] sm:$0xff] }
   0x4   :  { %722 = vst [vmem:[%s2012_s2 + $0x10] sm:$0xff] %v721_v2  ;;  %v735_v9 = vld [vmem:[%s2011_s0 + $0x48] sm:$0xff]  ;;  %v737_v10 = vld [vmem:[%s2011_s0 + $0x50] sm:$0xff]  ;;  %v739_v11 = vld [vmem:[%s2011_s0 + $0x58] sm:$0xff] }
   0x5   :  { %724 = vst [vmem:[%s2012_s2 + $0x18] sm:$0xff] %v723_v3  ;;  %v741_v12 = vld [vmem:[%s2011_s0 + $0x60] sm:$0xff]  ;;  %v743_v13 = vld [vmem:[%s2011_s0 + $0x68] sm:$0xff]  ;;  %v745_v14 = vld [vmem:[%s2011_s0 + $0x70] sm:$0xff] }
   0x6   :  { %726 = vst [vmem:[%s2012_s2 + $0x20] sm:$0xff] %v725_v4  ;;  %v747_v15 = vld [vmem:[%s2011_s0 + $0x78] sm:$0xff]  ;;  %v749_v16 = vld [vmem:[%s2011_s0 + $0x80] sm:$0xff]  ;;  %v751_v17 = vld [vmem:[%s2011_s0 + $0x88] sm:$0xff] }
   0x7   :  { %728 = vst [vmem:[%s2012_s2 + $0x28] sm:$0xff] %v727_v5  ;;  %v753_v18 = vld [vmem:[%s2011_s0 + $0x90] sm:$0xff]  ;;  %v755_v19 = vld [vmem:[%s2011_s0 + $0x98] sm:$0xff]  ;;  %v757_v20 = vld [vmem:[%s2011_s0 + $0xa0] sm:$0xff] }
   0x8   :  { %730 = vst [vmem:[%s2012_s2 + $0x30] sm:$0xff] %v729_v6  ;;  %v759_v21 = vld [vmem:[%s2011_s0 + $0xa8] sm:$0xff]  ;;  %v761_v22 = vld [vmem:[%s2011_s0 + $0xb0] sm:$0xff]  ;;  %v763_v23 = vld [vmem:[%s2011_s0 + $0xb8] sm:$0xff] }
   0x9   :  { %732 = vst [vmem:[%s2012_s2 + $0x38] sm:$0xff] %v731_v7  ;;  %v765_v24 = vld [vmem:[%s2011_s0 + $0xc0] sm:$0xff]  ;;  %v767_v25 = vld [vmem:[%s2011_s0 + $0xc8] sm:$0xff]  ;;  %v769_v26 = vld [vmem:[%s2011_s0 + $0xd0] sm:$0xff] }
   0xa   :  { %734 = vst [vmem:[%s2012_s2 + $0x40] sm:$0xff] %v733_v8  ;;  %v771_v27 = vld [vmem:[%s2011_s0 + $0xd8] sm:$0xff]  ;;  %v773_v28 = vld [vmem:[%s2011_s0 + $0xe0] sm:$0xff]  ;;  %v775_v29 = vld [vmem:[%s2011_s0 + $0xe8] sm:$0xff] }
   0xb   :  { %736 = vst [vmem:[%s2012_s2 + $0x48] sm:$0xff] %v735_v9  ;;  %v777_v30 = vld [vmem:[%s2011_s0 + $0xf0] sm:$0xff]  ;;  %v779_v31 = vld [vmem:[%s2011_s0 + $0xf8] sm:$0xff]  ;;  %v781_v32 = vld [vmem:[%s2011_s0 + $0x100] sm:$0xff] }
   0xc   :  { %738 = vst [vmem:[%s2012_s2 + $0x50] sm:$0xff] %v737_v10  ;;  %v783_v33 = vld [vmem:[%s2011_s0 + $0x108] sm:$0xff]  ;;  %v785_v34 = vld [vmem:[%s2011_s0 + $0x110] sm:$0xff]  ;;  %v787_v35 = vld [vmem:[%s2011_s0 + $0x118] sm:$0xff] }
   0xd   :  { %740 = vst [vmem:[%s2012_s2 + $0x58] sm:$0xff] %v739_v11  ;;  %v789_v36 = vld [vmem:[%s2011_s0 + $0x120] sm:$0xff]  ;;  %v791_v37 = vld [vmem:[%s2011_s0 + $0x128] sm:$0xff]  ;;  %v793_v38 = vld [vmem:[%s2011_s0 + $0x130] sm:$0xff] }
   0xe   :  { %742 = vst [vmem:[%s2012_s2 + $0x60] sm:$0xff] %v741_v12  ;;  %v795_v39 = vld [vmem:[%s2011_s0 + $0x138] sm:$0xff]  ;;  %v797_v40 = vld [vmem:[%s2011_s0 + $0x140] sm:$0xff]  ;;  %v799_v41 = vld [vmem:[%s2011_s0 + $0x148] sm:$0xff] }
   0xf   :  { %744 = vst [vmem:[%s2012_s2 + $0x68] sm:$0xff] %v743_v13  ;;  %v801_v42 = vld [vmem:[%s2011_s0 + $0x150] sm:$0xff]  ;;  %v803_v43 = vld [vmem:[%s2011_s0 + $0x158] sm:$0xff]  ;;  %v805_v44 = vld [vmem:[%s2011_s0 + $0x160] sm:$0xff] }
  0x10   :  { %746 = vst [vmem:[%s2012_s2 + $0x70] sm:$0xff] %v745_v14  ;;  %v807_v45 = vld [vmem:[%s2011_s0 + $0x168] sm:$0xff]  ;;  %v809_v46 = vld [vmem:[%s2011_s0 + $0x170] sm:$0xff]  ;;  %v811_v47 = vld [vmem:[%s2011_s0 + $0x178] sm:$0xff] }
  0x11   :  { %748 = vst [vmem:[%s2012_s2 + $0x78] sm:$0xff] %v747_v15  ;;  %v813_v48 = vld [vmem:[%s2011_s0 + $0x180] sm:$0xff]  ;;  %v815_v49 = vld [vmem:[%s2011_s0 + $0x188] sm:$0xff]  ;;  %v817_v50 = vld [vmem:[%s2011_s0 + $0x190] sm:$0xff] }
  0x12   :  { %750 = vst [vmem:[%s2012_s2 + $0x80] sm:$0xff] %v749_v16  ;;  %v819_v51 = vld [vmem:[%s2011_s0 + $0x198] sm:$0xff]  ;;  %v821_v52 = vld [vmem:[%s2011_s0 + $0x1a0] sm:$0xff]  ;;  %v823_v53 = vld [vmem:[%s2011_s0 + $0x1a8] sm:$0xff] }
  0x13   :  { %752 = vst [vmem:[%s2012_s2 + $0x88] sm:$0xff] %v751_v17  ;;  %v825_v54 = vld [vmem:[%s2011_s0 + $0x1b0] sm:$0xff]  ;;  %v827_v55 = vld [vmem:[%s2011_s0 + $0x1b8] sm:$0xff]  ;;  %v829_v56 = vld [vmem:[%s2011_s0 + $0x1c0] sm:$0xff] }
  0x14   :  { %754 = vst [vmem:[%s2012_s2 + $0x90] sm:$0xff] %v753_v18  ;;  %v831_v57 = vld [vmem:[%s2011_s0 + $0x1c8] sm:$0xff]  ;;  %v833_v58 = vld [vmem:[%s2011_s0 + $0x1d0] sm:$0xff]  ;;  %v835_v59 = vld [vmem:[%s2011_s0 + $0x1d8] sm:$0xff] }
  0x15   :  { %756 = vst [vmem:[%s2012_s2 + $0x98] sm:$0xff] %v755_v19  ;;  %v837_v60 = vld [vmem:[%s2011_s0 + $0x1e0] sm:$0xff]  ;;  %v839_v61 = vld [vmem:[%s2011_s0 + $0x1e8] sm:$0xff]  ;;  %v841_v62 = vld [vmem:[%s2011_s0 + $0x1f0] sm:$0xff] }
  0x16   :  { %758 = vst [vmem:[%s2012_s2 + $0xa0] sm:$0xff] %v757_v20  ;;  %v843_v63 = vld [vmem:[%s2011_s0 + $0x1f8] sm:$0xff]  ;;  %v845_v0 = vld [vmem:[%s2011_s0 + $0x200] sm:$0xff]  ;;  %v847_v1 = vld [vmem:[%s2011_s0 + $0x208] sm:$0xff] }
  0x17   :  { %760 = vst [vmem:[%s2012_s2 + $0xa8] sm:$0xff] %v759_v21  ;;  %v849_v2 = vld [vmem:[%s2011_s0 + $0x210] sm:$0xff]  ;;  %v851_v3 = vld [vmem:[%s2011_s0 + $0x218] sm:$0xff]  ;;  %v853_v4 = vld [vmem:[%s2011_s0 + $0x220] sm:$0xff] }
  0x18   :  { %762 = vst [vmem:[%s2012_s2 + $0xb0] sm:$0xff] %v761_v22  ;;  %v855_v5 = vld [vmem:[%s2011_s0 + $0x228] sm:$0xff]  ;;  %v857_v6 = vld [vmem:[%s2011_s0 + $0x230] sm:$0xff]  ;;  %v859_v7 = vld [vmem:[%s2011_s0 + $0x238] sm:$0xff] }
  0x19   :  { %764 = vst [vmem:[%s2012_s2 + $0xb8] sm:$0xff] %v763_v23  ;;  %v861_v8 = vld [vmem:[%s2011_s0 + $0x240] sm:$0xff]  ;;  %v863_v9 = vld [vmem:[%s2011_s0 + $0x248] sm:$0xff]  ;;  %v865_v10 = vld [vmem:[%s2011_s0 + $0x250] sm:$0xff] }
  0x1a   :  { %766 = vst [vmem:[%s2012_s2 + $0xc0] sm:$0xff] %v765_v24  ;;  %v867_v11 = vld [vmem:[%s2011_s0 + $0x258] sm:$0xff]  ;;  %v869_v12 = vld [vmem:[%s2011_s0 + $0x260] sm:$0xff]  ;;  %v871_v13 = vld [vmem:[%s2011_s0 + $0x268] sm:$0xff] }
  0x1b   :  { %768 = vst [vmem:[%s2012_s2 + $0xc8] sm:$0xff] %v767_v25  ;;  %v873_v14 = vld [vmem:[%s2011_s0 + $0x270] sm:$0xff]  ;;  %v875_v15 = vld [vmem:[%s2011_s0 + $0x278] sm:$0xff]  ;;  %v322_v16 = vld [vmem:[%s2013_s1] sm:$0xff] }
  0x1c   :  { %770 = vst [vmem:[%s2012_s2 + $0xd0] sm:$0xff] %v769_v26  ;;  %v878_v17 = vld [vmem:[%s2013_s1 + $0x8] sm:$0xff]  ;;  %v880_v18 = vld [vmem:[%s2013_s1 + $0x10] sm:$0xff]  ;;  %v882_v19 = vld [vmem:[%s2013_s1 + $0x18] sm:$0xff] }
  0x1d   :  { %772 = vst [vmem:[%s2012_s2 + $0xd8] sm:$0xff] %v771_v27  ;;  %v884_v20 = vld [vmem:[%s2013_s1 + $0x20] sm:$0xff]  ;;  %v886_v21 = vld [vmem:[%s2013_s1 + $0x28] sm:$0xff]  ;;  %v888_v22 = vld [vmem:[%s2013_s1 + $0x30] sm:$0xff] }
  0x1e   :  { %774 = vst [vmem:[%s2012_s2 + $0xe0] sm:$0xff] %v773_v28  ;;  %v890_v23 = vld [vmem:[%s2013_s1 + $0x38] sm:$0xff]  ;;  %v892_v24 = vld [vmem:[%s2013_s1 + $0x40] sm:$0xff]  ;;  %v894_v25 = vld [vmem:[%s2013_s1 + $0x48] sm:$0xff] }
  0x1f   :  { %776 = vst [vmem:[%s2012_s2 + $0xe8] sm:$0xff] %v775_v29  ;;  %v896_v26 = vld [vmem:[%s2013_s1 + $0x50] sm:$0xff]  ;;  %v898_v27 = vld [vmem:[%s2013_s1 + $0x58] sm:$0xff]  ;;  %v900_v28 = vld [vmem:[%s2013_s1 + $0x60] sm:$0xff] }
  0x20   :  { %778 = vst [vmem:[%s2012_s2 + $0xf0] sm:$0xff] %v777_v30  ;;  %v902_v29 = vld [vmem:[%s2013_s1 + $0x68] sm:$0xff]  ;;  %v904_v30 = vld [vmem:[%s2013_s1 + $0x70] sm:$0xff] }
  0x21   :  { %780 = vst [vmem:[%s2012_s2 + $0xf8] sm:$0xff] %v779_v31  ;;  %v906_v31 = vld [vmem:[%s2013_s1 + $0x78] sm:$0xff] }
  0x22   :  { %782 = vst [vmem:[%s2012_s2 + $0x100] sm:$0xff] %v781_v32  ;;  %v908_v32 = vld [vmem:[%s2013_s1 + $0x80] sm:$0xff] }
  0x23   :  { %784 = vst [vmem:[%s2012_s2 + $0x108] sm:$0xff] %v783_v33  ;;  %v910_v33 = vld [vmem:[%s2013_s1 + $0x88] sm:$0xff] }
  0x24   :  { %786 = vst [vmem:[%s2012_s2 + $0x110] sm:$0xff] %v785_v34  ;;  %v912_v34 = vld [vmem:[%s2013_s1 + $0x90] sm:$0xff] }
  0x25   :  { %788 = vst [vmem:[%s2012_s2 + $0x118] sm:$0xff] %v787_v35  ;;  %v914_v35 = vld [vmem:[%s2013_s1 + $0x98] sm:$0xff] }
  0x26   :  { %790 = vst [vmem:[%s2012_s2 + $0x120] sm:$0xff] %v789_v36  ;;  %v916_v36 = vld [vmem:[%s2013_s1 + $0xa0] sm:$0xff] }
  0x27   :  { %792 = vst [vmem:[%s2012_s2 + $0x128] sm:$0xff] %v791_v37  ;;  %v918_v37 = vld [vmem:[%s2013_s1 + $0xa8] sm:$0xff] }
  0x28   :  { %794 = vst [vmem:[%s2012_s2 + $0x130] sm:$0xff] %v793_v38  ;;  %v920_v38 = vld [vmem:[%s2013_s1 + $0xb0] sm:$0xff] }
  0x29   :  { %796 = vst [vmem:[%s2012_s2 + $0x138] sm:$0xff] %v795_v39  ;;  %v922_v39 = vld [vmem:[%s2013_s1 + $0xb8] sm:$0xff] }
  0x2a   :  { %798 = vst [vmem:[%s2012_s2 + $0x140] sm:$0xff] %v797_v40  ;;  %v924_v40 = vld [vmem:[%s2013_s1 + $0xc0] sm:$0xff] }
  0x2b   :  { %800 = vst [vmem:[%s2012_s2 + $0x148] sm:$0xff] %v799_v41  ;;  %v926_v41 = vld [vmem:[%s2013_s1 + $0xc8] sm:$0xff] }
  0x2c   :  { %802 = vst [vmem:[%s2012_s2 + $0x150] sm:$0xff] %v801_v42  ;;  %v928_v42 = vld [vmem:[%s2013_s1 + $0xd0] sm:$0xff] }
  0x2d   :  { %804 = vst [vmem:[%s2012_s2 + $0x158] sm:$0xff] %v803_v43  ;;  %v930_v43 = vld [vmem:[%s2013_s1 + $0xd8] sm:$0xff] }
  0x2e   :  { %806 = vst [vmem:[%s2012_s2 + $0x160] sm:$0xff] %v805_v44  ;;  %v932_v44 = vld [vmem:[%s2013_s1 + $0xe0] sm:$0xff] }
  0x2f   :  { %808 = vst [vmem:[%s2012_s2 + $0x168] sm:$0xff] %v807_v45  ;;  %v934_v45 = vld [vmem:[%s2013_s1 + $0xe8] sm:$0xff] }
  0x30   :  { %810 = vst [vmem:[%s2012_s2 + $0x170] sm:$0xff] %v809_v46  ;;  %v936_v46 = vld [vmem:[%s2013_s1 + $0xf0] sm:$0xff] }
  0x31   :  { %812 = vst [vmem:[%s2012_s2 + $0x178] sm:$0xff] %v811_v47  ;;  %v938_v47 = vld [vmem:[%s2013_s1 + $0xf8] sm:$0xff] }
  0x32   :  { %814 = vst [vmem:[%s2012_s2 + $0x180] sm:$0xff] %v813_v48  ;;  %v940_v48 = vld [vmem:[%s2013_s1 + $0x100] sm:$0xff] }
  0x33   :  { %816 = vst [vmem:[%s2012_s2 + $0x188] sm:$0xff] %v815_v49  ;;  %v942_v49 = vld [vmem:[%s2013_s1 + $0x108] sm:$0xff] }
  0x34   :  { %818 = vst [vmem:[%s2012_s2 + $0x190] sm:$0xff] %v817_v50  ;;  %v944_v50 = vld [vmem:[%s2013_s1 + $0x110] sm:$0xff] }
  0x35   :  { %820 = vst [vmem:[%s2012_s2 + $0x198] sm:$0xff] %v819_v51  ;;  %v946_v51 = vld [vmem:[%s2013_s1 + $0x118] sm:$0xff] }
  0x36   :  { %822 = vst [vmem:[%s2012_s2 + $0x1a0] sm:$0xff] %v821_v52  ;;  %v948_v52 = vld [vmem:[%s2013_s1 + $0x120] sm:$0xff] }
  0x37   :  { %824 = vst [vmem:[%s2012_s2 + $0x1a8] sm:$0xff] %v823_v53  ;;  %v950_v53 = vld [vmem:[%s2013_s1 + $0x128] sm:$0xff] }
  0x38   :  { %826 = vst [vmem:[%s2012_s2 + $0x1b0] sm:$0xff] %v825_v54  ;;  %v952_v54 = vld [vmem:[%s2013_s1 + $0x130] sm:$0xff] }
  0x39   :  { %828 = vst [vmem:[%s2012_s2 + $0x1b8] sm:$0xff] %v827_v55  ;;  %v954_v55 = vld [vmem:[%s2013_s1 + $0x138] sm:$0xff] }
  0x3a   :  { %830 = vst [vmem:[%s2012_s2 + $0x1c0] sm:$0xff] %v829_v56  ;;  %v956_v56 = vld [vmem:[%s2013_s1 + $0x140] sm:$0xff] }
  0x3b   :  { %832 = vst [vmem:[%s2012_s2 + $0x1c8] sm:$0xff] %v831_v57  ;;  %v958_v57 = vld [vmem:[%s2013_s1 + $0x148] sm:$0xff] }
  0x3c   :  { %834 = vst [vmem:[%s2012_s2 + $0x1d0] sm:$0xff] %v833_v58  ;;  %v960_v58 = vld [vmem:[%s2013_s1 + $0x150] sm:$0xff] }
  0x3d   :  { %836 = vst [vmem:[%s2012_s2 + $0x1d8] sm:$0xff] %v835_v59  ;;  %v962_v59 = vld [vmem:[%s2013_s1 + $0x158] sm:$0xff] }
  0x3e   :  { %838 = vst [vmem:[%s2012_s2 + $0x1e0] sm:$0xff] %v837_v60  ;;  %v964_v60 = vld [vmem:[%s2013_s1 + $0x160] sm:$0xff] }
  0x3f   :  { %840 = vst [vmem:[%s2012_s2 + $0x1e8] sm:$0xff] %v839_v61  ;;  %v966_v61 = vld [vmem:[%s2013_s1 + $0x168] sm:$0xff] }
  0x40   :  { %842 = vst [vmem:[%s2012_s2 + $0x1f0] sm:$0xff] %v841_v62  ;;  %v968_v62 = vld [vmem:[%s2013_s1 + $0x170] sm:$0xff] }
  0x41   :  { %844 = vst [vmem:[%s2012_s2 + $0x1f8] sm:$0xff] %v843_v63  ;;  %v970_v63 = vld [vmem:[%s2013_s1 + $0x178] sm:$0xff] }
  0x42   :  { %846 = vst [vmem:[%s2012_s2 + $0x200] sm:$0xff] %v845_v0  ;;  %v972_v0 = vld [vmem:[%s2013_s1 + $0x180] sm:$0xff] }
  0x43   :  { %848 = vst [vmem:[%s2012_s2 + $0x208] sm:$0xff] %v847_v1  ;;  %v974_v1 = vld [vmem:[%s2013_s1 + $0x188] sm:$0xff] }
  0x44   :  { %850 = vst [vmem:[%s2012_s2 + $0x210] sm:$0xff] %v849_v2  ;;  %v976_v2 = vld [vmem:[%s2013_s1 + $0x190] sm:$0xff] }
  0x45   :  { %852 = vst [vmem:[%s2012_s2 + $0x218] sm:$0xff] %v851_v3  ;;  %v978_v3 = vld [vmem:[%s2013_s1 + $0x198] sm:$0xff] }
  0x46   :  { %854 = vst [vmem:[%s2012_s2 + $0x220] sm:$0xff] %v853_v4  ;;  %v980_v4 = vld [vmem:[%s2013_s1 + $0x1a0] sm:$0xff] }
  0x47   :  { %856 = vst [vmem:[%s2012_s2 + $0x228] sm:$0xff] %v855_v5  ;;  %v982_v5 = vld [vmem:[%s2013_s1 + $0x1a8] sm:$0xff] }
  0x48   :  { %858 = vst [vmem:[%s2012_s2 + $0x230] sm:$0xff] %v857_v6  ;;  %v984_v6 = vld [vmem:[%s2013_s1 + $0x1b0] sm:$0xff] }
  0x49   :  { %860 = vst [vmem:[%s2012_s2 + $0x238] sm:$0xff] %v859_v7  ;;  %v986_v7 = vld [vmem:[%s2013_s1 + $0x1b8] sm:$0xff] }
  0x4a   :  { %862 = vst [vmem:[%s2012_s2 + $0x240] sm:$0xff] %v861_v8  ;;  %v988_v8 = vld [vmem:[%s2013_s1 + $0x1c0] sm:$0xff] }
  0x4b   :  { %864 = vst [vmem:[%s2012_s2 + $0x248] sm:$0xff] %v863_v9  ;;  %v990_v9 = vld [vmem:[%s2013_s1 + $0x1c8] sm:$0xff] }
  0x4c   :  { %866 = vst [vmem:[%s2012_s2 + $0x250] sm:$0xff] %v865_v10  ;;  %v992_v10 = vld [vmem:[%s2013_s1 + $0x1d0] sm:$0xff] }
  0x4d   :  { %868 = vst [vmem:[%s2012_s2 + $0x258] sm:$0xff] %v867_v11  ;;  %v994_v11 = vld [vmem:[%s2013_s1 + $0x1d8] sm:$0xff] }
  0x4e   :  { %870 = vst [vmem:[%s2012_s2 + $0x260] sm:$0xff] %v869_v12  ;;  %v996_v12 = vld [vmem:[%s2013_s1 + $0x1e0] sm:$0xff] }
  0x4f   :  { %872 = vst [vmem:[%s2012_s2 + $0x268] sm:$0xff] %v871_v13  ;;  %v998_v13 = vld [vmem:[%s2013_s1 + $0x1e8] sm:$0xff] }
  0x50   :  { %874 = vst [vmem:[%s2012_s2 + $0x270] sm:$0xff] %v873_v14  ;;  %v1000_v14 = vld [vmem:[%s2013_s1 + $0x1f0] sm:$0xff] }
  0x51   :  { %876 = vst [vmem:[%s2012_s2 + $0x278] sm:$0xff] %v875_v15  ;;  %v1002_v15 = vld [vmem:[%s2013_s1 + $0x1f8] sm:$0xff] }
  0x52   :  { %877 = vst [vmem:[%s2012_s2 + $0x280] sm:$0xff] %v322_v16  ;;  %v1004_v16 = vld [vmem:[%s2013_s1 + $0x200] sm:$0xff] }
  0x53   :  { %879 = vst [vmem:[%s2012_s2 + $0x288] sm:$0xff] %v878_v17  ;;  %v1006_v17 = vld [vmem:[%s2013_s1 + $0x208] sm:$0xff] }
  0x54   :  { %881 = vst [vmem:[%s2012_s2 + $0x290] sm:$0xff] %v880_v18  ;;  %v1008_v18 = vld [vmem:[%s2013_s1 + $0x210] sm:$0xff] }
  0x55   :  { %883 = vst [vmem:[%s2012_s2 + $0x298] sm:$0xff] %v882_v19  ;;  %v1010_v19 = vld [vmem:[%s2013_s1 + $0x218] sm:$0xff] }
  0x56   :  { %885 = vst [vmem:[%s2012_s2 + $0x2a0] sm:$0xff] %v884_v20  ;;  %v1012_v20 = vld [vmem:[%s2013_s1 + $0x220] sm:$0xff] }
  0x57   :  { %887 = vst [vmem:[%s2012_s2 + $0x2a8] sm:$0xff] %v886_v21  ;;  %v1014_v21 = vld [vmem:[%s2013_s1 + $0x228] sm:$0xff] }
  0x58   :  { %889 = vst [vmem:[%s2012_s2 + $0x2b0] sm:$0xff] %v888_v22  ;;  %v1016_v22 = vld [vmem:[%s2013_s1 + $0x230] sm:$0xff] }
  0x59   :  { %891 = vst [vmem:[%s2012_s2 + $0x2b8] sm:$0xff] %v890_v23  ;;  %v1018_v23 = vld [vmem:[%s2013_s1 + $0x238] sm:$0xff] }
  0x5a   :  { %893 = vst [vmem:[%s2012_s2 + $0x2c0] sm:$0xff] %v892_v24  ;;  %v1020_v24 = vld [vmem:[%s2013_s1 + $0x240] sm:$0xff] }
  0x5b   :  { %895 = vst [vmem:[%s2012_s2 + $0x2c8] sm:$0xff] %v894_v25  ;;  %v1022_v25 = vld [vmem:[%s2013_s1 + $0x248] sm:$0xff] }
  0x5c   :  { %897 = vst [vmem:[%s2012_s2 + $0x2d0] sm:$0xff] %v896_v26  ;;  %v1024_v26 = vld [vmem:[%s2013_s1 + $0x250] sm:$0xff] }
  0x5d   :  { %899 = vst [vmem:[%s2012_s2 + $0x2d8] sm:$0xff] %v898_v27  ;;  %v1026_v27 = vld [vmem:[%s2013_s1 + $0x258] sm:$0xff] }
  0x5e   :  { %901 = vst [vmem:[%s2012_s2 + $0x2e0] sm:$0xff] %v900_v28  ;;  %v1028_v28 = vld [vmem:[%s2013_s1 + $0x260] sm:$0xff] }
  0x5f   :  { %903 = vst [vmem:[%s2012_s2 + $0x2e8] sm:$0xff] %v902_v29  ;;  %v1030_v29 = vld [vmem:[%s2013_s1 + $0x268] sm:$0xff] }
  0x60   :  { %905 = vst [vmem:[%s2012_s2 + $0x2f0] sm:$0xff] %v904_v30  ;;  %v1032_v30 = vld [vmem:[%s2013_s1 + $0x270] sm:$0xff] }
  0x61   :  { %907 = vst [vmem:[%s2012_s2 + $0x2f8] sm:$0xff] %v906_v31  ;;  %v1034_v31 = vld [vmem:[%s2013_s1 + $0x278] sm:$0xff] }
  0x62   :  { %909 = vst [vmem:[%s2012_s2 + $0x300] sm:$0xff] %v908_v32 }
  0x63   :  { %911 = vst [vmem:[%s2012_s2 + $0x308] sm:$0xff] %v910_v33 }
  0x64   :  { %913 = vst [vmem:[%s2012_s2 + $0x310] sm:$0xff] %v912_v34 }
  0x65   :  { %915 = vst [vmem:[%s2012_s2 + $0x318] sm:$0xff] %v914_v35 }
  0x66   :  { %917 = vst [vmem:[%s2012_s2 + $0x320] sm:$0xff] %v916_v36 }
  0x67   :  { %919 = vst [vmem:[%s2012_s2 + $0x328] sm:$0xff] %v918_v37 }
  0x68   :  { %921 = vst [vmem:[%s2012_s2 + $0x330] sm:$0xff] %v920_v38 }
  0x69   :  { %923 = vst [vmem:[%s2012_s2 + $0x338] sm:$0xff] %v922_v39 }
  0x6a   :  { %925 = vst [vmem:[%s2012_s2 + $0x340] sm:$0xff] %v924_v40 }
  0x6b   :  { %927 = vst [vmem:[%s2012_s2 + $0x348] sm:$0xff] %v926_v41 }
  0x6c   :  { %929 = vst [vmem:[%s2012_s2 + $0x350] sm:$0xff] %v928_v42 }
  0x6d   :  { %931 = vst [vmem:[%s2012_s2 + $0x358] sm:$0xff] %v930_v43 }
  0x6e   :  { %933 = vst [vmem:[%s2012_s2 + $0x360] sm:$0xff] %v932_v44 }
  0x6f   :  { %935 = vst [vmem:[%s2012_s2 + $0x368] sm:$0xff] %v934_v45 }
  0x70   :  { %937 = vst [vmem:[%s2012_s2 + $0x370] sm:$0xff] %v936_v46 }
  0x71   :  { %939 = vst [vmem:[%s2012_s2 + $0x378] sm:$0xff] %v938_v47 }
  0x72   :  { %941 = vst [vmem:[%s2012_s2 + $0x380] sm:$0xff] %v940_v48 }
  0x73   :  { %943 = vst [vmem:[%s2012_s2 + $0x388] sm:$0xff] %v942_v49 }
  0x74   :  { %945 = vst [vmem:[%s2012_s2 + $0x390] sm:$0xff] %v944_v50 }
  0x75   :  { %947 = vst [vmem:[%s2012_s2 + $0x398] sm:$0xff] %v946_v51 }
  0x76   :  { %949 = vst [vmem:[%s2012_s2 + $0x3a0] sm:$0xff] %v948_v52 }
  0x77   :  { %951 = vst [vmem:[%s2012_s2 + $0x3a8] sm:$0xff] %v950_v53 }
  0x78   :  { %953 = vst [vmem:[%s2012_s2 + $0x3b0] sm:$0xff] %v952_v54 }
  0x79   :  { %955 = vst [vmem:[%s2012_s2 + $0x3b8] sm:$0xff] %v954_v55 }
  0x7a   :  { %957 = vst [vmem:[%s2012_s2 + $0x3c0] sm:$0xff] %v956_v56 }
  0x7b   :  { %959 = vst [vmem:[%s2012_s2 + $0x3c8] sm:$0xff] %v958_v57 }
  0x7c   :  { %961 = vst [vmem:[%s2012_s2 + $0x3d0] sm:$0xff] %v960_v58 }
  0x7d   :  { %963 = vst [vmem:[%s2012_s2 + $0x3d8] sm:$0xff] %v962_v59 }
  0x7e   :  { %965 = vst [vmem:[%s2012_s2 + $0x3e0] sm:$0xff] %v964_v60 }
  0x7f   :  { %967 = vst [vmem:[%s2012_s2 + $0x3e8] sm:$0xff] %v966_v61 }
  0x80   :  { %969 = vst [vmem:[%s2012_s2 + $0x3f0] sm:$0xff] %v968_v62 }
  0x81   :  { %971 = vst [vmem:[%s2012_s2 + $0x3f8] sm:$0xff] %v970_v63 }
  0x82   :  { %973 = vst [vmem:[%s2012_s2 + $0x400] sm:$0xff] %v972_v0 }
  0x83   :  { %975 = vst [vmem:[%s2012_s2 + $0x408] sm:$0xff] %v974_v1 }
  0x84   :  { %977 = vst [vmem:[%s2012_s2 + $0x410] sm:$0xff] %v976_v2 }
  0x85   :  { %979 = vst [vmem:[%s2012_s2 + $0x418] sm:$0xff] %v978_v3 }
  0x86   :  { %981 = vst [vmem:[%s2012_s2 + $0x420] sm:$0xff] %v980_v4 }
  0x87   :  { %983 = vst [vmem:[%s2012_s2 + $0x428] sm:$0xff] %v982_v5 }
  0x88   :  { %985 = vst [vmem:[%s2012_s2 + $0x430] sm:$0xff] %v984_v6 }
  0x89   :  { %987 = vst [vmem:[%s2012_s2 + $0x438] sm:$0xff] %v986_v7 }
  0x8a   :  { %989 = vst [vmem:[%s2012_s2 + $0x440] sm:$0xff] %v988_v8 }
  0x8b   :  { %991 = vst [vmem:[%s2012_s2 + $0x448] sm:$0xff] %v990_v9 }
  0x8c   :  { %993 = vst [vmem:[%s2012_s2 + $0x450] sm:$0xff] %v992_v10 }
  0x8d   :  { %995 = vst [vmem:[%s2012_s2 + $0x458] sm:$0xff] %v994_v11 }
  0x8e   :  { %997 = vst [vmem:[%s2012_s2 + $0x460] sm:$0xff] %v996_v12 }
  0x8f   :  { %999 = vst [vmem:[%s2012_s2 + $0x468] sm:$0xff] %v998_v13 }
  0x90   :  { %1001 = vst [vmem:[%s2012_s2 + $0x470] sm:$0xff] %v1000_v14 }
  0x91   :  { %1003 = vst [vmem:[%s2012_s2 + $0x478] sm:$0xff] %v1002_v15 }
  0x92   :  { %1005 = vst [vmem:[%s2012_s2 + $0x480] sm:$0xff] %v1004_v16 }
  0x93   :  { %1007 = vst [vmem:[%s2012_s2 + $0x488] sm:$0xff] %v1006_v17 }
  0x94   :  { %1009 = vst [vmem:[%s2012_s2 + $0x490] sm:$0xff] %v1008_v18 }
  0x95   :  { %1011 = vst [vmem:[%s2012_s2 + $0x498] sm:$0xff] %v1010_v19 }
  0x96   :  { %1013 = vst [vmem:[%s2012_s2 + $0x4a0] sm:$0xff] %v1012_v20 }
  0x97   :  { %1015 = vst [vmem:[%s2012_s2 + $0x4a8] sm:$0xff] %v1014_v21 }
  0x98   :  { %1017 = vst [vmem:[%s2012_s2 + $0x4b0] sm:$0xff] %v1016_v22 }
  0x99   :  { %1019 = vst [vmem:[%s2012_s2 + $0x4b8] sm:$0xff] %v1018_v23 }
  0x9a   :  { %1021 = vst [vmem:[%s2012_s2 + $0x4c0] sm:$0xff] %v1020_v24 }
  0x9b   :  { %1023 = vst [vmem:[%s2012_s2 + $0x4c8] sm:$0xff] %v1022_v25 }
  0x9c   :  { %1025 = vst [vmem:[%s2012_s2 + $0x4d0] sm:$0xff] %v1024_v26 }
  0x9d   :  { %1027 = vst [vmem:[%s2012_s2 + $0x4d8] sm:$0xff] %v1026_v27 }
  0x9e   :  { %1029 = vst [vmem:[%s2012_s2 + $0x4e0] sm:$0xff] %v1028_v28 }
  0x9f   :  { %1031 = vst [vmem:[%s2012_s2 + $0x4e8] sm:$0xff] %v1030_v29 }
  0xa0   :  { %1033 = vst [vmem:[%s2012_s2 + $0x4f0] sm:$0xff] %v1032_v30 }
  0xa1   :  { %1035 = vst [vmem:[%s2012_s2 + $0x4f8] sm:$0xff] %v1034_v31 }

// kernel: _lambda_.1
= control target key start
LH: loop header
LB: loop body
LE: loop exit
PB: predicated region body
PF: predicated region fallthrough
CT: control target
= control target key end

     0   :  { %9 = vsyncpa [#allocation3], 0  ;;  %s1730_s12 = smov 0   ;;  %s2777_s0 = inlined_call_operand.vmem [shape: f32[2,4,304], index: 0, kind: input, shape index: {}]   ;;  %s2778_s1 = inlined_call_operand.hbm [shape: f32[256,64], index: 1, kind: input, shape index: {}]   ;;  %s2779_s2 = inlined_call_operand.vmem [shape: f32[2,10,32,16], index: 2, kind: output, shape index: {0}]   ;;  %s2780_s3 = inlined_call_operand.vmem [shape: f32[2,10,32,16], index: 3, kind: output, shape index: {1}]  }
   0x1 LB: > { %s130_s15 = sshll.u32 %s2778_s1, 4  ;;  %s1429_s16 = sadd.s32 4294967295, %s1698_s12   ;;  %s1698_s12 = sphi %s1730_s12, %s15_s12   ;;  %s131_s15 = int_to_ptr.hbm [resolvable:$true] %s130_s15 }
   0x2   : > { %p1431_p0 = scmp.ge.s32.totalorder %s1698_s12, 1  ;;  %p119_p1 = scmp.lt.s32.totalorder %s1698_s12, 3 }
   0x3   : > { %p1638_p2 = scmp.eq.s32.totalorder %s1429_s16, 0  ;;  %s1700_s17 = smov [#allocation2]  }
   0x4   : > { %p120_p3 = pnand %p1431_p0, %p119_p1  ;;  %s132_s18 = sshll.u32 %s1700_s17, 4  ;;  %s133_s18 = int_to_ptr.vmem [resolvable:$true] %s132_s18 }
   0x5   : > { %s1701_s19 = smov 128   ;;  %s1702_s20 = smov 8  }
   0x6   : > { %p1634_p4 = pneg %p120_p3  ;;  %156 = sbr.rel (%p120_p3) target bundleno = 692 (0x2b4), region = 28 }
   0x8   : > { %p1635_p5 = pnand %p1638_p2, %p1634_p4 }
   0xa   : > { %1637 = dma.hbm_to_vmem [thread:$0]  (!%p1635_p5), %s131_s15, 4096, %s133_s18, [#allocation3], %s1701_s19, %s1701_s19, %s1702_s20  }
   0xb   : > { %1693 = dma.done.wait (%p1638_p2), [#allocation3], 4096  }
   0xc   : > { %1695 = vsyncadd (%p1638_p2), [#allocation3], 4294963200  ;;  %p186_p6 = scmp.lt.s32.totalorder %s1429_s16, 1  ;;  %s1703_s25 = smov 80   ;;  %vm296_vm0 = vcmask 1040384   ;;  %vm298_vm1 = vcmask 1041408  }
   0xd   : > { %s1704_s26 = smov 96   ;;  %s1705_s27 = smov 112   ;;  %vm300_vm2 = vcmask 1042432   ;;  %vm302_vm3 = vcmask 1043456   ;;  %vm253_vm4 = vcmask 392192   ;;  %vm260_vm5 = vcmask 261120  }
   0xe   : > { %s2782_s16 = smov (!%p186_p6, %s1429_s16), 1  ;;  %s1706_s28 = smov 48   ;;  %vm304_vm6 = vcmask 1044480   ;;  %vm267_vm7 = vcmask 130048   ;;  %vm306_vm8 = vcmask 1045504   ;;  %vm308_vm9 = vcmask 1046528  }
   0xf   : > { %s1628_s21 = smul.u32 12, %s2782_s16  ;;  %s1707_s29 = smov 64   ;;  %vm317_vm10 = vcmask 523264  }
  0x10   : > { %s1708_s30 = smov 32   ;;  %s1709_s4 = smov 16  }
  0x11   : > { %s1747_s24 = scalar_lea.vmem %s2777_s0, %s1628_s21  ;;  %s1629_s5 = smul.u32 320, %s2782_s16 }
  0x12   : > { %v1750_v0 = vld [vmem:[%s1747_s24 + $0x2] ss:$4 sm:$0x7]  ;;  %v1762_v2 = vld [vmem:[%s1747_s24 + $0x3] ss:$4 sm:$0x7] }
  0x13   : > { %v1753_v1 = vperm.slane %v1750_v0, 1  ;;  %v1765_v3 = vperm.slane %v1762_v2, 1  ;;  %v727_v4 = vperm.slane %v1750_v0, 2  ;;  %v897_v5 = vperm.slane %v1762_v2, 2  ;;  %s2268_s8 = scalar_lea.vmem %s2779_s2, %s1629_s5  ;;  %s2277_s11 = scalar_lea.vmem %s2780_s3, %s1629_s5 }
  0x14   : > { %v682_v6 = vperm.slane %v1750_v0, 0  ;;  %v852_v7 = vperm.slane %v1762_v2, 0  ;;  %v1804_v8 = vld [vmem:[%s1747_s24 + $0x1] ss:$4 sm:$0x7] }
  0x15   : > { %721 = vrot.lane.b32.xlu2 %v1753_v1, %s1703_s25  ;;  %718 = vrot.lane.b32.xlu1 %v1753_v1, %s1704_s26  ;;  %v1807_v9 = vld [vmem:[%s1747_s24] ss:$4 sm:$0x7]  ;;  %v1810_v10 = vperm.slane %v1804_v8, 1  ;;  %v557_v16 = vperm.slane %v1804_v8, 2  ;;  %v1861_v24 = vperm.slane %v1804_v8, 0 }
  0x16   : > { %715 = vrot.lane.b32.xlu0 %v1753_v1, %s1705_s27  ;;  %v1813_v11 = vperm.slane %v1807_v9, 1  ;;  %v283_v14 = vperm.slane %v1807_v9, 2  ;;  %v1853_v20 = vperm.slane %v1807_v9, 0 }
  0x1d   : > { %891 = vrot.lane.b32.xlu2 %v1765_v3, %s1703_s25  ;;  %888 = vrot.lane.b32.xlu1 %v1765_v3, %s1704_s26 }
  0x1e   : > { %885 = vrot.lane.b32.xlu0 %v1765_v3, %s1705_s27 }
  0x25   : > { %728 = vrot.lane.b32.xlu2 %v727_v4, %s1706_s28  ;;  %724 = vrot.lane.b32.xlu1 %v1753_v1, %s1707_s29 }
  0x26   : > { %698 = vrot.lane.b32.xlu0 %v1753_v1, %s1706_s28 }
  0x2d   : > { %898 = vrot.lane.b32.xlu2 %v897_v5, %s1706_s28  ;;  %894 = vrot.lane.b32.xlu1 %v1765_v3, %s1707_s29 }
  0x2e   : > { %868 = vrot.lane.b32.xlu0 %v1765_v3, %s1706_s28 }
  0x35   : > { %732 = vrot.lane.b32.xlu2 %v727_v4, %s1708_s30  ;;  %704 = vrot.lane.b32.xlu1 %v1753_v1, %s1708_s30 }
  0x36   : > { %683 = vrot.lane.b32.xlu0 %v682_v6, %s1705_s27 }
  0x3d   : > { %902 = vrot.lane.b32.xlu2 %v897_v5, %s1708_s30  ;;  %874 = vrot.lane.b32.xlu1 %v1765_v3, %s1708_s30 }
  0x3e   : > { %853 = vrot.lane.b32.xlu0 %v852_v7, %s1705_s27 }
  0x45   : > { %736 = vrot.lane.b32.xlu2 %v727_v4, %s1709_s4  ;;  %710 = vrot.lane.b32.xlu1 %v1753_v1, %s1709_s4 }
  0x46   : > { %686 = vrot.lane.b32.xlu0 %v682_v6, %s1704_s26 }
  0x4d   : > { %906 = vrot.lane.b32.xlu2 %v897_v5, %s1709_s4  ;;  %880 = vrot.lane.b32.xlu1 %v1765_v3, %s1709_s4 }
  0x4e   : > { %856 = vrot.lane.b32.xlu0 %v852_v7, %s1704_s26 }
  0x55   : > { %689 = vrot.lane.b32.xlu2 %v682_v6, %s1703_s25  ;;  %545 = vrot.lane.b32.xlu1 %v1810_v10, %s1705_s27 }
  0x56   : > { %271 = vrot.lane.b32.xlu0 %v1813_v11, %s1705_s27 }
  0x5d   : > { %548 = vrot.lane.b32.xlu2 %v1810_v10, %s1704_s26  ;;  %274 = vrot.lane.b32.xlu1 %v1813_v11, %s1704_s26 }
  0x5e   : > { %859 = vrot.lane.b32.xlu0 %v852_v7, %s1703_s25 }
  0x65   : > { %862 = vrot.lane.b32.xlu2 %v852_v7, %s1707_s29  ;;  %696 = vrot.lane.b32.xlu1 %v682_v6, %s1706_s28 }
  0x66   : > { %692 = vrot.lane.b32.xlu0 %v682_v6, %s1707_s29 }
  0x6d   : > { %551 = vrot.lane.b32.xlu2 %v1810_v10, %s1703_s25  ;;  %277 = vrot.lane.b32.xlu1 %v1813_v11, %s1703_s25 }
  0x6e   : > { %866 = vrot.lane.b32.xlu0 %v852_v7, %s1706_s28 }
  0x6f   : > { %v722_v12 = vpop.permute.xlu2 %721 }
  0x75   : > { %251 = vrot.lane.b32.xlu2 %v1813_v11, %s1706_s28  ;;  %872 = vrot.lane.b32.xlu1 %v852_v7, %s1708_s30 }
  0x76   : > { %702 = vrot.lane.b32.xlu0 %v682_v6, %s1708_s30 }
  0x77   : > { %v1837_v13 = vpop.permute.xlu2 %891 }
  0x7d   : > { %528 = vrot.lane.b32.xlu2 %v1810_v10, %s1706_s28  ;;  %284 = vrot.lane.b32.xlu1 %v283_v14, %s1706_s28 }
  0x7e   : > { %280 = vrot.lane.b32.xlu0 %v1813_v11, %s1707_s29 }
  0x7f   : > { %v729_v15 = vpop.permute.xlu2 %728 }
  0x85   : > { %708 = vrot.lane.b32.xlu2 %v682_v6, %s1709_s4  ;;  %558 = vrot.lane.b32.xlu1 %v557_v16, %s1706_s28 }
  0x86   : > { %554 = vrot.lane.b32.xlu0 %v1810_v10, %s1707_s29 }
  0x87   : > { %v1850_v17 = vpop.permute.xlu2 %898  ;;  %v719_v18 = vpop.permute.xlu1 %718 }
  0x88   : > { %v716_v19 = vpop.permute.xlu0 %715 }
  0x89   : > { %v747_v34 = vsel %vm296_vm0, %v1753_v1, %v716_v19 }
  0x8a   : > { %v748_v37 = vsel %vm298_vm1, %v747_v34, %v719_v18 }
  0x8b   : > { %v749_v39 = vsel %vm300_vm2, %v748_v37, %v722_v12 }
  0x8d   : > { %258 = vrot.lane.b32.xlu2 %v1813_v11, %s1708_s30  ;;  %236 = vrot.lane.b32.xlu1 %v1853_v20, %s1705_s27 }
  0x8e   : > { %878 = vrot.lane.b32.xlu0 %v852_v7, %s1709_s4 }
  0x8f   : > { %v733_v21 = vpop.permute.xlu2 %732  ;;  %v889_v22 = vpop.permute.xlu1 %888 }
  0x90   : > { %v886_v23 = vpop.permute.xlu0 %885 }
  0x91   : > { %v917_v42 = vsel %vm296_vm0, %v1765_v3, %v886_v23 }
  0x92   : > { %v918_v47 = vsel %vm298_vm1, %v917_v42, %v889_v22  ;;  %v1985_v42 = vld [vmem:[#allocation2 + $0x8] sm:$0xff] }
  0x93   : > { %v919_v52 = vsel %vm300_vm2, %v918_v47, %v1837_v13 }
  0x95   : > { %534 = vrot.lane.b32.xlu2 %v1810_v10, %s1708_s30  ;;  %513 = vrot.lane.b32.xlu1 %v1861_v24, %s1705_s27 }
  0x96   : > { %288 = vrot.lane.b32.xlu0 %v283_v14, %s1708_s30 }
  0x97   : > { %v903_v25 = vpop.permute.xlu2 %902  ;;  %v725_v26 = vpop.permute.xlu1 %724 }
  0x98   : > { %v1868_v27 = vpop.permute.xlu0 %698  ;;  %v750_v40 = vsel %vm302_vm3, %v749_v39, %v725_v26 }
  0x99   : > { %v730_v41 = vsel %vm253_vm4, %v1868_v27, %v729_v15 }
  0x9a   : > { %v751_v44 = vsel %vm304_vm6, %v750_v40, %v730_v41  ;;  %v1981_v40 = vld [vmem:[#allocation2] sm:$0xff] }
  0x9d   : > { %265 = vrot.lane.b32.xlu2 %v1813_v11, %s1709_s4  ;;  %239 = vrot.lane.b32.xlu1 %v1853_v20, %s1704_s26 }
  0x9e   : > { %562 = vrot.lane.b32.xlu0 %v557_v16, %s1708_s30 }
  0x9f   : > { %v737_v28 = vpop.permute.xlu2 %736  ;;  %v895_v29 = vpop.permute.xlu1 %894 }
  0xa0   : > { %v1875_v30 = vpop.permute.xlu0 %868  ;;  %v920_v53 = vsel %vm302_vm3, %v919_v52, %v895_v29 }
  0xa1   : > { %v900_v54 = vsel %vm253_vm4, %v1875_v30, %v1850_v17 }
  0xa2   : > { %v921_v56 = vsel %vm304_vm6, %v920_v53, %v900_v54 }
  0xa5   : > { %540 = vrot.lane.b32.xlu2 %v1810_v10, %s1709_s4  ;;  %516 = vrot.lane.b32.xlu1 %v1861_v24, %s1704_s26 }
  0xa6   : > { %292 = vrot.lane.b32.xlu0 %v283_v14, %s1709_s4 }
  0xa7   : > { %v907_v31 = vpop.permute.xlu2 %906  ;;  %v1882_v32 = vpop.permute.xlu1 %704 }
  0xa8   : > { %v1884_v33 = vpop.permute.xlu0 %683  ;;  %v734_v43 = vsel %vm260_vm5, %v1882_v32, %v733_v21 }
  0xa9   : > { %v752_v50 = vsel %vm306_vm8, %v751_v44, %v734_v43 }
  0xad   : > { %519 = vrot.lane.b32.xlu2 %v1861_v24, %s1703_s25  ;;  %242 = vrot.lane.b32.xlu1 %v1853_v20, %s1703_s25 }
  0xae   : > { %566 = vrot.lane.b32.xlu0 %v557_v16, %s1709_s4 }
  0xaf   : > { %v1893_v35 = vpop.permute.xlu1 %874  ;;  %v1895_v36 = vpop.permute.xlu2 %689 }
  0xb0   : > { %v854_v38 = vpop.permute.xlu0 %853  ;;  %v904_v55 = vsel %vm260_vm5, %v1893_v35, %v903_v25 }
  0xb1   : > { %v922_v61 = vsel %vm306_vm8, %v921_v56, %v904_v55  ;;  %v2008_v55 = vld [vmem:[#allocation2 + $0x20] sm:$0xff] }
  0xb5   : > { %522 = vrot.lane.b32.xlu2 %v1861_v24, %s1707_s29  ;;  %249 = vrot.lane.b32.xlu1 %v1853_v20, %s1706_s28 }
  0xb6   : > { %245 = vrot.lane.b32.xlu0 %v1853_v20, %s1707_s29 }
  0xb7   : > { %v711_v45 = vpop.permute.xlu1 %710  ;;  %v549_v46 = vpop.permute.xlu2 %548 }
  0xb8   : > { %v738_v48 = vsel %vm267_vm7, %v711_v45, %v737_v28  ;;  %v687_v49 = vpop.permute.xlu0 %686 }
  0xb9   : > { %v753_v51 = vsel %vm308_vm9, %v752_v50, %v738_v48 }
  0xba   : > { %1509 = vmatpush.xpose.msk.msra.mxu2 %vm317_vm10, %v753_v51  ;;  %v2000_v51 = vld [vmem:[#allocation2 + $0x18] sm:$0xff] }
  0xbd   : > { %532 = vrot.lane.b32.xlu2 %v1861_v24, %s1708_s30  ;;  %256 = vrot.lane.b32.xlu1 %v1853_v20, %s1708_s30 }
  0xbe   : > { %526 = vrot.lane.b32.xlu0 %v1861_v24, %s1706_s28 }
  0xbf   : > { %v881_v57 = vpop.permute.xlu1 %880  ;;  %v863_v58 = vpop.permute.xlu2 %862 }
  0xc0   : > { %v908_v59 = vsel %vm267_vm7, %v881_v57, %v907_v31  ;;  %v857_v60 = vpop.permute.xlu0 %856 }
  0xc1   : > { %v923_v62 = vsel %vm308_vm9, %v922_v61, %v908_v59  ;;  %v2015_v59 = vld [vmem:[#allocation2 + $0x28] sm:$0xff] }
  0xc2   : > { %1544 = vmatpush.xpose.msk.msra.mxu3 %vm317_vm10, %v923_v62 }
  0xc5   : > { %538 = vrot.lane.b32.xlu1 %v1861_v24, %s1709_s4 }
  0xc6   : > { %263 = vrot.lane.b32.xlu0 %v1853_v20, %s1709_s4 }
  0xc7   : > { %v546_v63 = vpop.permute.xlu1 %545  ;;  %v552_v4 = vpop.permute.xlu2 %551 }
  0xc8   : > { %v577_v1 = vsel %vm296_vm0, %v1810_v10, %v546_v63  ;;  %v272_v3 = vpop.permute.xlu0 %271  ;;  %v910_v10 = vsel %vm296_vm0, %v1762_v2, %v854_v38 }
  0xc9   : > { %v578_v5 = vsel %vm298_vm1, %v577_v1, %v549_v46  ;;  %v310_v7 = vsel %vm296_vm0, %v1813_v11, %v272_v3  ;;  %v911_v18 = vsel %vm298_vm1, %v910_v10, %v857_v60  ;;  %v740_v11 = vsel %vm296_vm0, %v1750_v0, %v1884_v33 }
  0xca   : > { %v1945_v6 = vsel %vm300_vm2, %v578_v5, %v552_v4  ;;  %v741_v25 = vsel %vm298_vm1, %v740_v11, %v687_v49 }
  0xcb   : > { %v742_v26 = vsel %vm300_vm2, %v741_v25, %v1895_v36 }
  0xcf   : > { %v275_v12 = vpop.permute.xlu1 %274  ;;  %v1950_v15 = vpop.permute.xlu2 %251 }
  0xd0   : > { %v311_v13 = vsel %vm298_vm1, %v310_v7, %v275_v12  ;;  %v860_v14 = vpop.permute.xlu0 %859 }
  0xd1   : > { %v912_v20 = vsel %vm300_vm2, %v911_v18, %v860_v14 }
  0xd2   : > { %v913_v23 = vsel %vm302_vm3, %v912_v20, %v863_v58 }
  0xd7   : > { %v697_v16 = vpop.permute.xlu1 %696  ;;  %v1955_v19 = vpop.permute.xlu2 %528 }
  0xd8   : > { %v693_v17 = vpop.permute.xlu0 %692  ;;  %v700_v28 = vsel %vm253_vm4, %v697_v16, %v1868_v27 }
  0xd9   : > { %v743_v29 = vsel %vm302_vm3, %v742_v26, %v693_v17  ;;  %v2055_v26 = vld [vmem:[#allocation2 + $0x40] sm:$0xff] }
  0xdf   : > { %v278_v21 = vpop.permute.xlu1 %277  ;;  %v709_v31 = vpop.permute.xlu2 %708 }
  0xe0   : > { %v867_v22 = vpop.permute.xlu0 %866  ;;  %v712_v36 = vsel %vm267_vm7, %v709_v31, %v711_v45  ;;  %v1991_v45 = vld [vmem:[#allocation2 + $0x10] sm:$0xff]  ;;  %v312_v58 = vsel %vm300_vm2, %v311_v13, %v278_v21 }
  0xe1   : > { %v870_v24 = vsel %vm253_vm4, %v867_v22, %v1875_v30  ;;  %v744_v30 = vsel %vm304_vm6, %v743_v29, %v700_v28  ;;  %v2032_v13 = vld [vmem:[#allocation2 + $0x30] sm:$0xff] }
  0xe2   : > { %v914_v2 = vsel %vm304_vm6, %v913_v23, %v870_v24  ;;  %v2049_v23 = vld [vmem:[#allocation2 + $0x38] sm:$0xff] }
  0xe7   : > { %v873_v34 = vpop.permute.xlu1 %872  ;;  %v1989_v43 = vpop.permute.xlu2 %258 }
  0xe8   : > { %v876_v0 = vsel %vm260_vm5, %v873_v34, %v1893_v35  ;;  %v703_v33 = vpop.permute.xlu0 %702 }
  0xe9   : > { %v706_v37 = vsel %vm260_vm5, %v703_v33, %v1882_v32  ;;  %v915_v38 = vsel %vm306_vm8, %v914_v2, %v876_v0 }
  0xea   : > { %v745_v39 = vsel %vm306_vm8, %v744_v30, %v706_v37 }
  0xeb   : > { %v746_v27 = vsel %vm308_vm9, %v745_v39, %v712_v36  ;;  %v2072_v39 = vld [vmem:[#allocation2 + $0x48] sm:$0xff] }
  0xec   : > { %1510 = vmatpush.xpose.msk.msra.mxu2 %vm317_vm10, %v746_v27 }
  0xef   : > { %1511 = vmatmul.msk.f32.vlgmr.msra.gmra.mxu2 %vm317_vm10, %v1981_v40  ;;  %v285_v35 = vpop.permute.xlu1 %284  ;;  %v1996_v49 = vpop.permute.xlu2 %534 }
  0xf0   : > { %v281_v41 = vpop.permute.xlu0 %280  ;;  %v286_v60 = vsel %vm253_vm4, %v1950_v15, %v285_v35 }
  0xf1   : > { %v313_v61 = vsel %vm302_vm3, %v312_v58, %v281_v41  ;;  %v2151_v58 = vld [vmem:[#allocation2 + $0x90] sm:$0xff] }
  0xf2   : > { %v314_v3 = vsel %vm304_vm6, %v313_v61, %v286_v60  ;;  %v2162_v60 = vld [vmem:[#allocation2 + $0x98] sm:$0xff] }
  0xf7   : > { %1512 = vmatmul.msk.f32.gmra.mxu2 %vm317_vm10, %v1985_v42  ;;  %v559_v32 = vpop.permute.xlu1 %558  ;;  %v2006_v54 = vpop.permute.xlu2 %265 }
  0xf8   : > { %v555_v44 = vpop.permute.xlu0 %554  ;;  %v560_v14 = vsel %vm253_vm4, %v1955_v19, %v559_v32 }
  0xf9   : > { %v580_v16 = vsel %vm302_vm3, %v1945_v6, %v555_v44 }
  0xfa   : > { %v581_v18 = vsel %vm304_vm6, %v580_v16, %v560_v14 }
  0xff   : > { %1513 = vmatmul.msk.f32.gmra.mxu2 %vm317_vm10, %v1991_v45  ;;  %v237_v46 = vpop.permute.xlu1 %236  ;;  %v541_v62 = vpop.permute.xlu2 %540 }
 0x100   : > { %v879_v47 = vpop.permute.xlu0 %878  ;;  %v297_v33 = vsel %vm296_vm0, %v1807_v9, %v237_v46 }
 0x101   : > { %v882_v48 = vsel %vm267_vm7, %v879_v47, %v881_v57 }
 0x102   : > { %v916_v50 = vsel %vm308_vm9, %v915_v38, %v882_v48 }
 0x103   : > { %1545 = vmatpush.xpose.msk.msra.mxu3 %vm317_vm10, %v916_v50 }
 0x106   : > { %1546 = vmatmul.msk.f32.vlgmr.msra.gmra.mxu3 %vm317_vm10, %v1981_v40 }
 0x107   : > { %1514 = vmatmul.msk.f32.gmra.mxu2 %vm317_vm10, %v2000_v51  ;;  %v514_v52 = vpop.permute.xlu1 %513  ;;  %v520_v20 = vpop.permute.xlu2 %519 }
 0x108   : > { %v289_v53 = vpop.permute.xlu0 %288  ;;  %v570_v28 = vsel %vm296_vm0, %v1804_v8, %v514_v52  ;;  %v211_v52 = vld [vmem:[#allocation2 + $0x50] sm:$0xff] }
 0x109   : > { %v290_v63 = vsel %vm260_vm5, %v1989_v43, %v289_v53  ;;  %v212_v53 = vld [vmem:[#allocation2 + $0x58] sm:$0xff] }
 0x10a   : > { %v315_v7 = vsel %vm306_vm8, %v314_v3, %v290_v63 }
 0x10e   : > { %1547 = vmatmul.msk.f32.gmra.mxu3 %vm317_vm10, %v1985_v42 }
 0x10f   : > { %1515 = vmatmul.msk.f32.gmra.mxu2 %vm317_vm10, %v2008_v55  ;;  %v240_v56 = vpop.permute.xlu1 %239  ;;  %v523_v2 = vpop.permute.xlu2 %522 }
 0x110   : > { %v563_v57 = vpop.permute.xlu0 %562  ;;  %v299_v8 = vsel %vm298_vm1, %v297_v33, %v240_v56  ;;  %v218_v56 = vld [vmem:[#allocation2 + $0x88] sm:$0xff] }
 0x111   : > { %v564_v17 = vsel %vm260_vm5, %v1996_v49, %v563_v57 }
 0x112   : > { %v582_v11 = vsel %vm306_vm8, %v581_v18, %v564_v17  ;;  %v221_v17 = vld [vmem:[#allocation2 + $0xa0] sm:$0xff] }
 0x116   : > { %1548 = vmatmul.msk.f32.gmra.mxu3 %vm317_vm10, %v1991_v45 }
 0x117   : > { %1516 = vmatmul.msk.f32.gmra.mxu2 %vm317_vm10, %v2015_v59  ;;  %v517_v1 = vpop.permute.xlu1 %516  ;;  %v533_v37 = vpop.permute.xlu2 %532 }
 0x118   : > { %v293_v4 = vpop.permute.xlu0 %292  ;;  %v571_v29 = vsel %vm298_vm1, %v570_v28, %v517_v1 }
 0x119   : > { %v294_v5 = vsel %vm267_vm7, %v2006_v54, %v293_v4  ;;  %v572_v0 = vsel %vm300_vm2, %v571_v29, %v520_v20 }
 0x11a   : > { %v316_v12 = vsel %vm308_vm9, %v315_v7, %v294_v5  ;;  %v573_v36 = vsel %vm302_vm3, %v572_v0, %v523_v2 }
 0x11b   : > { %1439 = vmatpush.xpose.msk.msra.mxu0 %vm317_vm10, %v316_v12 }
 0x11e   : > { %1549 = vmatmul.msk.f32.gmra.mxu3 %vm317_vm10, %v2000_v51 }
 0x11f   : > { %1517 = vmatmul.msk.f32.gmra.mxu2 %vm317_vm10, %v2032_v13  ;;  %v243_v10 = vpop.permute.xlu1 %242 }
 0x120   : > { %v567_v21 = vpop.permute.xlu0 %566  ;;  %v301_v38 = vsel %vm300_vm2, %v299_v8, %v243_v10  ;;  %v225_v8 = vld [vmem:[#allocation2 + $0xc0] sm:$0xff] }
 0x121   : > { %v568_v22 = vsel %vm267_vm7, %v541_v62, %v567_v21 }
 0x122   : > { %v583_v6 = vsel %vm308_vm9, %v582_v11, %v568_v22  ;;  %v222_v22 = vld [vmem:[#allocation2 + $0xa8] sm:$0xff] }
 0x123   : > { %1474 = vmatpush.xpose.msk.msra.mxu1 %vm317_vm10, %v583_v6 }
 0x126   : > { %1550 = vmatmul.msk.f32.gmra.mxu3 %vm317_vm10, %v2008_v55 }
 0x127   : > { %1518 = vmatmul.msk.f32.gmra.mxu2 %vm317_vm10, %v2049_v23  ;;  %v250_v24 = vpop.permute.xlu1 %249 }
 0x128   : > { %v246_v25 = vpop.permute.xlu0 %245  ;;  %v254_v35 = vsel %vm253_vm4, %v250_v24, %v1950_v15 }
 0x129   : > { %v303_v27 = vsel %vm302_vm3, %v301_v38, %v246_v25  ;;  %v223_v25 = vld [vmem:[#allocation2 + $0xb0] sm:$0xff] }
 0x12a   : > { %v305_v44 = vsel %vm304_vm6, %v303_v27, %v254_v35  ;;  %v2238_v27 = vld [vmem:[#allocation2 + $0xc8] sm:$0xff] }
 0x12e   : > { %1551 = vmatmul.msk.f32.gmra.mxu3 %vm317_vm10, %v2015_v59 }
 0x12f   : > { %1519 = vmatmul.msk.f32.gmra.mxu2 %vm317_vm10, %v2055_v26  ;;  %v257_v31 = vpop.permute.xlu1 %256 }
 0x130   : > { %v527_v34 = vpop.permute.xlu0 %526  ;;  %v261_v9 = vsel %vm260_vm5, %v257_v31, %v1989_v43  ;;  %v224_v31 = vld [vmem:[#allocation2 + $0xb8] sm:$0xff] }
 0x131   : > { %v530_v30 = vsel %vm253_vm4, %v527_v34, %v1955_v19  ;;  %v536_v19 = vsel %vm260_vm5, %v533_v37, %v1996_v49  ;;  %v307_v48 = vsel %vm306_vm8, %v305_v44, %v261_v9 }
 0x132   : > { %v574_v41 = vsel %vm304_vm6, %v573_v36, %v530_v30 }
 0x133   : > { %v575_v47 = vsel %vm306_vm8, %v574_v41, %v536_v19 }
 0x136   : > { %1552 = vmatmul.msk.f32.gmra.mxu3 %vm317_vm10, %v2032_v13 }
 0x137   : > { %1520 = vmatmul.msk.f32.gmra.mxu2 %vm317_vm10, %v2072_v39  ;;  %v539_v32 = vpop.permute.xlu1 %538 }
 0x138   : > { %v264_v46 = vpop.permute.xlu0 %263  ;;  %v542_v15 = vsel %vm267_vm7, %v539_v32, %v541_v62  ;;  %v2246_v32 = vld [vmem:[#allocation2 + $0xd0] sm:$0xff] }
 0x139   : > { %v268_v43 = vsel %vm267_vm7, %v264_v46, %v2006_v54  ;;  %v576_v50 = vsel %vm308_vm9, %v575_v47, %v542_v15  ;;  %v213_v54 = vld [vmem:[#allocation2 + $0x60] sm:$0xff] }
 0x13a   : > { %v309_v49 = vsel %vm308_vm9, %v307_v48, %v268_v43  ;;  %1475 = vmatpush.xpose.msk.msra.mxu1 %vm317_vm10, %v576_v50 }
 0x13b   : > { %1440 = vmatpush.xpose.msk.msra.mxu0 %vm317_vm10, %v309_v49 }
 0x13d   : > { %1476 = vmatmul.msk.f32.vlgmr.msra.gmra.mxu1 %vm317_vm10, %v1981_v40 }
 0x13e   : > { %1441 = vmatmul.msk.f32.vlgmr.msra.gmra.mxu0 %vm317_vm10, %v1981_v40  ;;  %1553 = vmatmul.msk.f32.gmra.mxu3 %vm317_vm10, %v2049_v23  ;;  %v214_v40 = vld [vmem:[#allocation2 + $0x68] sm:$0xff] }
 0x13f   : > { %1521 = vmatmul.msk.f32.gmra.mxu2 %vm317_vm10, %v211_v52 }
 0x145   : > { %1477 = vmatmul.msk.f32.gmra.mxu1 %vm317_vm10, %v1985_v42 }
 0x146   : > { %1442 = vmatmul.msk.f32.gmra.mxu0 %vm317_vm10, %v1985_v42  ;;  %1554 = vmatmul.msk.f32.gmra.mxu3 %vm317_vm10, %v2055_v26  ;;  %v215_v42 = vld [vmem:[#allocation2 + $0x70] sm:$0xff] }
 0x147   : > { %1522 = vmatmul.msk.f32.gmra.mxu2 %vm317_vm10, %v212_v53 }
 0x14d   : > { %1478 = vmatmul.msk.f32.gmra.mxu1 %vm317_vm10, %v1991_v45 }
 0x14e   : > { %1443 = vmatmul.msk.f32.gmra.mxu0 %vm317_vm10, %v1991_v45  ;;  %1555 = vmatmul.msk.f32.gmra.mxu3 %vm317_vm10, %v2072_v39  ;;  %v216_v45 = vld [vmem:[#allocation2 + $0x78] sm:$0xff] }
 0x14f   : > { %1523 = vmatmul.msk.f32.gmra.mxu2 %vm317_vm10, %v213_v54 }
 0x155   : > { %1479 = vmatmul.msk.f32.gmra.mxu1 %vm317_vm10, %v2000_v51 }
 0x156   : > { %1444 = vmatmul.msk.f32.gmra.mxu0 %vm317_vm10, %v2000_v51  ;;  %1556 = vmatmul.msk.f32.gmra.mxu3 %vm317_vm10, %v211_v52  ;;  %v217_v51 = vld [vmem:[#allocation2 + $0x80] sm:$0xff] }
 0x157   : > { %1524 = vmatmul.msk.f32.gmra.mxu2 %vm317_vm10, %v214_v40 }
 0x15d   : > { %1480 = vmatmul.msk.f32.gmra.mxu1 %vm317_vm10, %v2008_v55 }
 0x15e   : > { %1445 = vmatmul.msk.f32.gmra.mxu0 %vm317_vm10, %v2008_v55  ;;  %1557 = vmatmul.msk.f32.gmra.mxu3 %vm317_vm10, %v212_v53 }
 0x15f   : > { %1525 = vmatmul.msk.f32.gmra.mxu2 %vm317_vm10, %v215_v42 }
 0x165   : > { %1481 = vmatmul.msk.f32.gmra.mxu1 %vm317_vm10, %v2015_v59 }
 0x166   : > { %1446 = vmatmul.msk.f32.gmra.mxu0 %vm317_vm10, %v2015_v59  ;;  %1558 = vmatmul.msk.f32.gmra.mxu3 %vm317_vm10, %v213_v54 }
 0x167   : > { %1526 = vmatmul.msk.f32.gmra.mxu2 %vm317_vm10, %v216_v45 }
 0x16d   : > { %1482 = vmatmul.msk.f32.gmra.mxu1 %vm317_vm10, %v2032_v13 }
 0x16e   : > { %1447 = vmatmul.msk.f32.gmra.mxu0 %vm317_vm10, %v2032_v13  ;;  %1559 = vmatmul.msk.f32.gmra.mxu3 %vm317_vm10, %v214_v40 }
 0x16f   : > { %1527 = vmatmul.msk.f32.gmra.mxu2 %vm317_vm10, %v217_v51 }
 0x172   : > { %v2141_v55 = vpop.f32.mrf.mxu2 }
 0x173   : > { %v1237_v49 = vmul.f32 %v2141_v55, %v2141_v55 }
 0x175   : > { %1483 = vmatmul.msk.f32.gmra.mxu1 %vm317_vm10, %v2049_v23 }
 0x176   : > { %1448 = vmatmul.msk.f32.gmra.mxu0 %vm317_vm10, %v2049_v23  ;;  %1560 = vmatmul.msk.f32.gmra.mxu3 %vm317_vm10, %v215_v42 }
 0x177   : > { %1528 = vmatmul.msk.f32.gmra.mxu2 %vm317_vm10, %v218_v56 }
 0x17a   : > { %v2149_v57 = vpop.f32.mrf.mxu2 }
 0x17d   : > { %1484 = vmatmul.msk.f32.gmra.mxu1 %vm317_vm10, %v2055_v26 }
 0x17e   : > { %1449 = vmatmul.msk.f32.gmra.mxu0 %vm317_vm10, %v2055_v26  ;;  %1561 = vmatmul.msk.f32.gmra.mxu3 %vm317_vm10, %v216_v45 }
 0x17f   : > { %1529 = vmatmul.msk.f32.gmra.mxu2 %vm317_vm10, %v2151_v58 }
 0x182   : > { %v2160_v59 = vpop.f32.mrf.mxu2 }
 0x185   : > { %1485 = vmatmul.msk.f32.gmra.mxu1 %vm317_vm10, %v2072_v39 }
 0x186   : > { %1450 = vmatmul.msk.f32.gmra.mxu0 %vm317_vm10, %v2072_v39  ;;  %1562 = vmatmul.msk.f32.gmra.mxu3 %vm317_vm10, %v217_v51 }
 0x187   : > { %1530 = vmatmul.msk.f32.gmra.mxu2 %vm317_vm10, %v2162_v60 }
 0x189   : > { %v2171_v61 = vpop.f32.mrf.mxu3 }
 0x18a   : > { %v2173_v62 = vpop.f32.mrf.mxu2 }
 0x18d   : > { %1486 = vmatmul.msk.f32.gmra.mxu1 %vm317_vm10, %v211_v52 }
 0x18e   : > { %1451 = vmatmul.msk.f32.gmra.mxu0 %vm317_vm10, %v211_v52  ;;  %1563 = vmatmul.msk.f32.gmra.mxu3 %vm317_vm10, %v218_v56 }
 0x18f   : > { %1531 = vmatmul.msk.f32.gmra.mxu2 %vm317_vm10, %v221_v17 }
 0x191   : > { %v2178_v63 = vpop.f32.mrf.mxu3 }
 0x192   : > { %v789_v1 = vpop.f32.mrf.mxu2 }
 0x193   : > { %v1238_v1 = vmul.f32 %v2149_v57, %v2149_v57 }
 0x195   : > { %1487 = vmatmul.msk.f32.gmra.mxu1 %vm317_vm10, %v212_v53 }
 0x196   : > { %1452 = vmatmul.msk.f32.gmra.mxu0 %vm317_vm10, %v212_v53  ;;  %1564 = vmatmul.msk.f32.gmra.mxu3 %vm317_vm10, %v2151_v58 }
 0x197   : > { %1532 = vmatmul.msk.f32.gmra.mxu2 %vm317_vm10, %v222_v22 }
 0x199   : > { %v2184_v3 = vpop.f32.mrf.mxu3 }
 0x19a   : > { %v791_v4 = vpop.f32.mrf.mxu2 }
 0x19d   : > { %1488 = vmatmul.msk.f32.gmra.mxu1 %vm317_vm10, %v213_v54 }
 0x19e   : > { %1453 = vmatmul.msk.f32.gmra.mxu0 %vm317_vm10, %v213_v54  ;;  %1565 = vmatmul.msk.f32.gmra.mxu3 %vm317_vm10, %v2162_v60 }
 0x19f   : > { %1533 = vmatmul.msk.f32.gmra.mxu2 %vm317_vm10, %v223_v25 }
 0x1a1   : > { %v2190_v5 = vpop.f32.mrf.mxu3 }
 0x1a2   : > { %v793_v7 = vpop.f32.mrf.mxu2 }
 0x1a5   : > { %1489 = vmatmul.msk.f32.gmra.mxu1 %vm317_vm10, %v214_v40 }
 0x1a6   : > { %1454 = vmatmul.msk.f32.gmra.mxu0 %vm317_vm10, %v214_v40  ;;  %1566 = vmatmul.msk.f32.gmra.mxu3 %vm317_vm10, %v221_v17  ;;  %v2263_v40 = vld [vmem:[#allocation2 + $0xd8] sm:$0xff] }
 0x1a7   : > { %1534 = vmatmul.msk.f32.gmra.mxu2 %vm317_vm10, %v224_v31 }
 0x1a9   : > { %v959_v12 = vpop.f32.mrf.mxu3 }
 0x1aa   : > { %v795_v13 = vpop.f32.mrf.mxu2 }
 0x1ad   : > { %1490 = vmatmul.msk.f32.gmra.mxu1 %vm317_vm10, %v215_v42 }
 0x1ae   : > { %1455 = vmatmul.msk.f32.gmra.mxu0 %vm317_vm10, %v215_v42  ;;  %1567 = vmatmul.msk.f32.gmra.mxu3 %vm317_vm10, %v222_v22 }
 0x1af   : > { %1535 = vmatmul.msk.f32.gmra.mxu2 %vm317_vm10, %v225_v8 }
 0x1b1   : > { %v961_v14 = vpop.f32.mrf.mxu3 }
 0x1b2   : > { %v797_v16 = vpop.f32.mrf.mxu2 }
 0x1b5   : > { %1491 = vmatmul.msk.f32.gmra.mxu1 %vm317_vm10, %v216_v45 }
 0x1b6   : > { %1456 = vmatmul.msk.f32.gmra.mxu0 %vm317_vm10, %v216_v45  ;;  %1568 = vmatmul.msk.f32.gmra.mxu3 %vm317_vm10, %v223_v25 }
 0x1b7   : > { %1536 = vmatmul.msk.f32.gmra.mxu2 %vm317_vm10, %v2238_v27 }
 0x1b9   : > { %v963_v10 = vpop.f32.mrf.mxu3 }
 0x1ba   : > { %v799_v18 = vpop.f32.mrf.mxu2  ;;  %v2200_v20 = vpop.f32.mrf.mxu1 }
 0x1bb   : > { %v2202_v21 = vpop.f32.mrf.mxu0 }
 0x1bd   : > { %1492 = vmatmul.msk.f32.gmra.mxu1 %vm317_vm10, %v217_v51 }
 0x1be   : > { %1457 = vmatmul.msk.f32.gmra.mxu0 %vm317_vm10, %v217_v51  ;;  %1569 = vmatmul.msk.f32.gmra.mxu3 %vm317_vm10, %v224_v31 }
 0x1bf   : > { %1537 = vmatmul.msk.f32.gmra.mxu2 %vm317_vm10, %v2246_v32 }
 0x1c1   : > { %v965_v11 = vpop.f32.mrf.mxu3 }
 0x1c2   : > { %v801_v6 = vpop.f32.mrf.mxu2  ;;  %v2208_v23 = vpop.f32.mrf.mxu1 }
 0x1c3   : > { %v2210_v24 = vpop.f32.mrf.mxu0 }
 0x1c5   : > { %1493 = vmatmul.msk.f32.gmra.mxu1 %vm317_vm10, %v218_v56 }
 0x1c6   : > { %1458 = vmatmul.msk.f32.gmra.mxu0 %vm317_vm10, %v218_v56  ;;  %1570 = vmatmul.msk.f32.gmra.mxu3 %vm317_vm10, %v225_v8  ;;  %v2285_v56 = vld [vmem:[#allocation2 + $0xe0] sm:$0xff] }
 0x1c7   : > { %1538 = vmatmul.msk.f32.gmra.mxu2 %vm317_vm10, %v2263_v40 }
 0x1c9   : > { %v967_v2 = vpop.f32.mrf.mxu3 }
 0x1ca   : > { %v803_v26 = vpop.f32.mrf.mxu2  ;;  %v2216_v28 = vpop.f32.mrf.mxu1 }
 0x1cb   : > { %v2218_v29 = vpop.f32.mrf.mxu0 }
 0x1cd   : > { %1494 = vmatmul.msk.f32.gmra.mxu1 %vm317_vm10, %v2151_v58 }
 0x1ce   : > { %1459 = vmatmul.msk.f32.gmra.mxu0 %vm317_vm10, %v2151_v58  ;;  %1571 = vmatmul.msk.f32.gmra.mxu3 %vm317_vm10, %v2238_v27 }
 0x1cf   : > { %1539 = vmatmul.msk.f32.gmra.mxu2 %vm317_vm10, %v2285_v56 }
 0x1d1   : > { %v969_v34 = vpop.f32.mrf.mxu3 }
 0x1d2   : > { %v805_v0 = vpop.f32.mrf.mxu2  ;;  %v2226_v33 = vpop.f32.mrf.mxu1  ;;  %v2329_v34 = vld [vmem:[#allocation2 + $0xf0] sm:$0xff] }
 0x1d3   : > { %v2228_v30 = vpop.f32.mrf.mxu0 }
 0x1d5   : > { %1495 = vmatmul.msk.f32.gmra.mxu1 %vm317_vm10, %v2162_v60 }
 0x1d6   : > { %1460 = vmatmul.msk.f32.gmra.mxu0 %vm317_vm10, %v2162_v60  ;;  %1572 = vmatmul.msk.f32.gmra.mxu3 %vm317_vm10, %v2246_v32 }
 0x1d9   : > { %v971_v37 = vpop.f32.mrf.mxu3 }
 0x1da   : > { %v807_v38 = vpop.f32.mrf.mxu2  ;;  %v619_v36 = vpop.f32.mrf.mxu1 }
 0x1db   : > { %v449_v39 = vpop.f32.mrf.mxu0 }
 0x1dd   : > { %1496 = vmatmul.msk.f32.gmra.mxu1 %vm317_vm10, %v221_v17 }
 0x1de   : > { %1461 = vmatmul.msk.f32.gmra.mxu0 %vm317_vm10, %v221_v17  ;;  %1573 = vmatmul.msk.f32.gmra.mxu3 %vm317_vm10, %v2263_v40  ;;  %v2305_v17 = vld [vmem:[#allocation2 + $0xe8] sm:$0xff] }
 0x1df   : > { %1540 = vmatmul.msk.f32.gmra.mxu2 %vm317_vm10, %v2305_v17 }
 0x1e1   : > { %v973_v35 = vpop.f32.mrf.mxu3 }
 0x1e2   : > { %v809_v41 = vpop.f32.mrf.mxu2  ;;  %v621_v9 = vpop.f32.mrf.mxu1 }
 0x1e3   : > { %v451_v19 = vpop.f32.mrf.mxu0  ;;  %v1240_v9 = vmul.f32 %v2173_v62, %v2173_v62 }
 0x1e5   : > { %1497 = vmatmul.msk.f32.gmra.mxu1 %vm317_vm10, %v222_v22 }
 0x1e6   : > { %1462 = vmatmul.msk.f32.gmra.mxu0 %vm317_vm10, %v222_v22  ;;  %1574 = vmatmul.msk.f32.gmra.mxu3 %vm317_vm10, %v2285_v56  ;;  %v1239_v22 = vmul.f32 %v2160_v59, %v2160_v59 }
 0x1e7   : > { %1541 = vmatmul.msk.f32.gmra.mxu2 %vm317_vm10, %v2329_v34 }
 0x1e9   : > { %v975_v44 = vpop.f32.mrf.mxu3 }
 0x1ea   : > { %v811_v46 = vpop.f32.mrf.mxu2  ;;  %v623_v15 = vpop.f32.mrf.mxu1 }
 0x1eb   : > { %v453_v47 = vpop.f32.mrf.mxu0 }
 0x1ed   : > { %1498 = vmatmul.msk.f32.gmra.mxu1 %vm317_vm10, %v223_v25 }
 0x1ee   : > { %1463 = vmatmul.msk.f32.gmra.mxu0 %vm317_vm10, %v223_v25  ;;  %1575 = vmatmul.msk.f32.gmra.mxu3 %vm317_vm10, %v2305_v17 }
 0x1f1   : > { %v977_v43 = vpop.f32.mrf.mxu3 }
 0x1f2   : > { %v2255_v48 = vpop.f32.mrf.mxu2  ;;  %v625_v50 = vpop.f32.mrf.mxu1 }
 0x1f3   : > { %v1245_v52 = vmul.f32 %v2255_v48, %v2255_v48  ;;  %v1270_v53 = vmul.f32 %v2255_v48, %v2141_v55  ;;  %v455_v54 = vpop.f32.mrf.mxu0  ;;  %v1274_v0 = vmul.f32 %v2171_v61, %v2255_v48 }
 0x1f4   : > { %v2371_v54 = vld [vmem:[#allocation2 + $0xf8] sm:$0xff] }
 0x1f5   : > { %v1253_v42 = vadd.f32 %v1245_v52, %v1237_v49  ;;  %v1282_v45 = vsub.f32 %v1270_v53, %v1270_v53  ;;  %1499 = vmatmul.msk.f32.gmra.mxu1 %vm317_vm10, %v224_v31  ;;  %1542 = vmatmul.msk.f32.gmra.mxu2 %vm317_vm10, %v2371_v54 }
 0x1f6   : > { %1464 = vmatmul.msk.f32.gmra.mxu0 %vm317_vm10, %v224_v31  ;;  %1576 = vmatmul.msk.f32.gmra.mxu3 %vm317_vm10, %v2329_v34 }
 0x1f7   : > { %1602 = vst.msk [vmem:[%s2268_s8 + $0xe0] sm:$0xff] %vm267_vm7, %v1253_v42 }
 0x1f8   : > { %1610 = vst.msk [vmem:[%s2277_s11 + $0xe0] sm:$0xff] %vm267_vm7, %v1282_v45  ;;  %v1242_v45 = vmul.f32 %v2178_v63, %v2149_v57 }
 0x1f9   : > { %v979_v51 = vpop.f32.mrf.mxu3 }
 0x1fa   : > { %v2287_v58 = vpop.f32.mrf.mxu2  ;;  %v627_v60 = vpop.f32.mrf.mxu1 }
 0x1fb   : > { %v1246_v4 = vmul.f32 %v2287_v58, %v2287_v58  ;;  %v1271_v7 = vmul.f32 %v2287_v58, %v2149_v57  ;;  %v457_v12 = vpop.f32.mrf.mxu0  ;;  %v1275_v42 = vmul.f32 %v2178_v63, %v2287_v58 }
 0x1fd   : > { %v1254_v13 = vadd.f32 %v1246_v4, %v1238_v1  ;;  %v1283_v14 = vsub.f32 %v1271_v7, %v1271_v7  ;;  %1500 = vmatmul.msk.f32.gmra.mxu1 %vm317_vm10, %v225_v8  ;;  %v1300_v1 = vmul.f32 %v2178_v63, %v2178_v63 }
 0x1fe   : > { %1465 = vmatmul.msk.f32.gmra.mxu0 %vm317_vm10, %v225_v8  ;;  %v1241_v8 = vmul.f32 %v2171_v61, %v2141_v55  ;;  %1577 = vmatmul.msk.f32.gmra.mxu3 %vm317_vm10, %v2371_v54 }
 0x1ff   : > { %1603 = vst.msk [vmem:[%s2268_s8 + $0xe8] sm:$0xff] %vm267_vm7, %v1254_v13 }
 0x200   : > { %1611 = vst.msk [vmem:[%s2277_s11 + $0xe8] sm:$0xff] %vm267_vm7, %v1283_v14 }
 0x201   : > { %v981_v16 = vpop.f32.mrf.mxu3 }
 0x202   : > { %v2307_v10 = vpop.f32.mrf.mxu2  ;;  %v629_v18 = vpop.f32.mrf.mxu1 }
 0x203   : > { %v1247_v11 = vmul.f32 %v2307_v10, %v2307_v10  ;;  %v1272_v6 = vmul.f32 %v2307_v10, %v2160_v59  ;;  %v459_v25 = vpop.f32.mrf.mxu0 }
 0x205   : > { %v1255_v2 = vadd.f32 %v1247_v11, %v1239_v22  ;;  %v1284_v26 = vsub.f32 %v1272_v6, %v1272_v6  ;;  %1501 = vmatmul.msk.f32.gmra.mxu1 %vm317_vm10, %v2238_v27  ;;  %v1276_v11 = vmul.f32 %v2184_v3, %v2307_v10  ;;  %v1243_v6 = vmul.f32 %v2184_v3, %v2160_v59 }
 0x206   : > { %1466 = vmatmul.msk.f32.gmra.mxu0 %vm317_vm10, %v2238_v27  ;;  %v1299_v27 = vmul.f32 %v2171_v61, %v2171_v61 }
 0x207   : > { %1604 = vst.msk [vmem:[%s2268_s8 + $0xf0] sm:$0xff] %vm267_vm7, %v1255_v2 }
 0x208   : > { %1612 = vst.msk [vmem:[%s2277_s11 + $0xf0] sm:$0xff] %vm267_vm7, %v1284_v26  ;;  %v1301_v26 = vmul.f32 %v2184_v3, %v2184_v3 }
 0x209   : > { %v2327_v31 = vpop.f32.mrf.mxu3 }
 0x20a   : > { %v1249_v37 = vmul.f32 %v2327_v31, %v2255_v48  ;;  %v1278_v38 = vmul.f32 %v2327_v31, %v2141_v55  ;;  %v2339_v36 = vpop.f32.mrf.mxu2  ;;  %v631_v39 = vpop.f32.mrf.mxu1  ;;  %v1303_v35 = vmul.f32 %v2327_v31, %v2327_v31  ;;  %v1316_v41 = vmul.f32 %v2327_v31, %v2171_v61 }
 0x20b   : > { %v461_v19 = vpop.f32.mrf.mxu0  ;;  %v1248_v15 = vmul.f32 %v2339_v36, %v2339_v36  ;;  %v1273_v47 = vmul.f32 %v2339_v36, %v2173_v62 }
 0x20c   : > { %v1257_v44 = vadd.f32 %v1249_v37, %v1241_v8  ;;  %v1286_v46 = vsub.f32 %v1274_v0, %v1278_v38  ;;  %v1307_v43 = vadd.f32 %v1303_v35, %v1299_v27  ;;  %v1320_v50 = vsub.f32 %v1316_v41, %v1316_v41 }
 0x20d   : > { %1502 = vmatmul.msk.f32.gmra.mxu1 %vm317_vm10, %v2246_v32  ;;  %v1256_v49 = vadd.f32 %v1248_v15, %v1240_v9  ;;  %v1285_v52 = vsub.f32 %v1273_v47, %v1273_v47  ;;  %v1277_v9 = vmul.f32 %v2190_v5, %v2339_v36  ;;  %v1244_v19 = vmul.f32 %v2190_v5, %v2173_v62 }
 0x20e   : > { %1606 = vst.msk [vmem:[%s2268_s8 + $0x100] sm:$0xff] %vm267_vm7, %v1257_v44  ;;  %1467 = vmatmul.msk.f32.gmra.mxu0 %vm317_vm10, %v2246_v32  ;;  %v1302_v15 = vmul.f32 %v2190_v5, %v2190_v5 }
 0x20f   : > { %1614 = vst.msk [vmem:[%s2277_s11 + $0x100] sm:$0xff] %vm267_vm7, %v1286_v46 }
 0x210   : > { %1618 = vst.msk [vmem:[%s2268_s8 + $0x120] sm:$0xff] %vm267_vm7, %v1307_v43 }
 0x211   : > { %1622 = vst.msk [vmem:[%s2277_s11 + $0x120] sm:$0xff] %vm267_vm7, %v1320_v50  ;;  %v2369_v53 = vpop.f32.mrf.mxu3 }
 0x212   : > { %1605 = vst.msk [vmem:[%s2268_s8 + $0xf8] sm:$0xff] %vm267_vm7, %v1256_v49  ;;  %v1250_v32 = vmul.f32 %v2369_v53, %v2287_v58  ;;  %v1279_v51 = vmul.f32 %v2369_v53, %v2149_v57  ;;  %v633_v60 = vpop.f32.mrf.mxu1  ;;  %v1304_v4 = vmul.f32 %v2369_v53, %v2369_v53  ;;  %v1317_v7 = vmul.f32 %v2369_v53, %v2178_v63 }
 0x213   : > { %1613 = vst.msk [vmem:[%s2277_s11 + $0xf8] sm:$0xff] %vm267_vm7, %v1285_v52  ;;  %v463_v12 = vpop.f32.mrf.mxu0 }
 0x214   : > { %v1258_v13 = vadd.f32 %v1250_v32, %v1242_v45  ;;  %v1287_v14 = vsub.f32 %v1275_v42, %v1279_v51  ;;  %v1308_v16 = vadd.f32 %v1304_v4, %v1300_v1  ;;  %v1321_v18 = vsub.f32 %v1317_v7, %v1317_v7  ;;  %v825_v4 = vpop.f32.mrf.mxu2 }
 0x215   : > { %1503 = vmatmul.msk.f32.gmra.mxu1 %vm317_vm10, %v2263_v40  ;;  %v1019_v12 = vmul.f32 %v2202_v21, %v2202_v21 }
 0x216   : > { %1607 = vst.msk [vmem:[%s2268_s8 + $0x108] sm:$0xff] %vm267_vm7, %v1258_v13  ;;  %1468 = vmatmul.msk.f32.gmra.mxu0 %vm317_vm10, %v2263_v40  ;;  %v1027_v13 = vmul.f32 %v2141_v55, %v2202_v21 }
 0x217   : > { %1615 = vst.msk [vmem:[%s2277_s11 + $0x108] sm:$0xff] %vm267_vm7, %v1287_v14 }
 0x218   : > { %1619 = vst.msk [vmem:[%s2268_s8 + $0x128] sm:$0xff] %vm267_vm7, %v1308_v16 }
 0x219   : > { %1623 = vst.msk [vmem:[%s2277_s11 + $0x128] sm:$0xff] %vm267_vm7, %v1321_v18  ;;  %v2407_v22 = vpop.f32.mrf.mxu3 }
 0x21a   : > { %v1251_v40 = vmul.f32 %v2407_v22, %v2307_v10  ;;  %v1280_v25 = vmul.f32 %v2407_v22, %v2160_v59  ;;  %v635_v2 = vpop.f32.mrf.mxu1  ;;  %v1305_v0 = vmul.f32 %v2407_v22, %v2407_v22  ;;  %v1318_v8 = vmul.f32 %v2407_v22, %v2184_v3 }
 0x21b   : > { %v465_v37 = vpop.f32.mrf.mxu0 }
 0x21c   : > { %v1259_v38 = vadd.f32 %v1251_v40, %v1243_v6  ;;  %v1288_v39 = vsub.f32 %v1276_v11, %v1280_v25  ;;  %v1309_v27 = vadd.f32 %v1305_v0, %v1301_v26  ;;  %v1322_v35 = vsub.f32 %v1318_v8, %v1318_v8 }
 0x21d   : > { %1504 = vmatmul.msk.f32.gmra.mxu1 %vm317_vm10, %v2285_v56  ;;  %v1103_v6 = vmul.f32 %v2255_v48, %v2202_v21  ;;  %v1107_v37 = vmul.f32 %v2327_v31, %v2202_v21 }
 0x21e   : > { %1608 = vst.msk [vmem:[%s2268_s8 + $0x110] sm:$0xff] %vm267_vm7, %v1259_v38  ;;  %1469 = vmatmul.msk.f32.gmra.mxu0 %vm317_vm10, %v2285_v56 }
 0x21f   : > { %1616 = vst.msk [vmem:[%s2277_s11 + $0x110] sm:$0xff] %vm267_vm7, %v1288_v39 }
 0x220   : > { %1620 = vst.msk [vmem:[%s2268_s8 + $0x130] sm:$0xff] %vm267_vm7, %v1309_v27 }
 0x221   : > { %1624 = vst.msk [vmem:[%s2277_s11 + $0x130] sm:$0xff] %vm267_vm7, %v1322_v35  ;;  %v2435_v41 = vpop.f32.mrf.mxu3 }
 0x222   : > { %v1252_v56 = vmul.f32 %v2435_v41, %v2339_v36  ;;  %v1281_v44 = vmul.f32 %v2435_v41, %v2173_v62  ;;  %v637_v46 = vpop.f32.mrf.mxu1  ;;  %v1306_v47 = vmul.f32 %v2435_v41, %v2435_v41  ;;  %v1319_v43 = vmul.f32 %v2435_v41, %v2190_v5 }
 0x223   : > { %v467_v50 = vpop.f32.mrf.mxu0 }
 0x224   : > { %v1260_v49 = vadd.f32 %v1252_v56, %v1244_v19  ;;  %v1289_v52 = vsub.f32 %v1277_v9, %v1281_v44  ;;  %v1310_v42 = vadd.f32 %v1306_v47, %v1302_v15  ;;  %v1323_v45 = vsub.f32 %v1319_v43, %v1319_v43 }
 0x225   : > { %1505 = vmatmul.msk.f32.gmra.mxu1 %vm317_vm10, %v2305_v17  ;;  %v1023_v9 = vmul.f32 %v2200_v20, %v2202_v21  ;;  %v1143_v15 = vmul.f32 %v2200_v20, %v2200_v20 }
 0x226   : > { %1609 = vst.msk [vmem:[%s2268_s8 + $0x118] sm:$0xff] %vm267_vm7, %v1260_v49  ;;  %1470 = vmatmul.msk.f32.gmra.mxu0 %vm317_vm10, %v2305_v17  ;;  %v1147_v49 = vmul.f32 %v2141_v55, %v2200_v20 }
 0x227   : > { %1617 = vst.msk [vmem:[%s2277_s11 + $0x118] sm:$0xff] %vm267_vm7, %v1289_v52 }
 0x228   : > { %1621 = vst.msk [vmem:[%s2268_s8 + $0x138] sm:$0xff] %vm267_vm7, %v1310_v42 }
 0x229   : > { %1625 = vst.msk [vmem:[%s2277_s11 + $0x138] sm:$0xff] %vm267_vm7, %v1323_v45  ;;  %v995_v14 = vpop.f32.mrf.mxu3 }
 0x22a   : > { %v639_v32 = vpop.f32.mrf.mxu1 }
 0x22b   : > { %v469_v51 = vpop.f32.mrf.mxu0  ;;  %v1151_v32 = vmul.f32 %v2171_v61, %v2200_v20 }
 0x22d   : > { %1506 = vmatmul.msk.f32.gmra.mxu1 %vm317_vm10, %v2329_v34 }
 0x22e   : > { %1471 = vmatmul.msk.f32.gmra.mxu0 %vm317_vm10, %v2329_v34  ;;  %v1031_v34 = vmul.f32 %v2171_v61, %v2202_v21 }
 0x231   : > { %v997_v45 = vpop.f32.mrf.mxu3 }
 0x232   : > { %v641_v60 = vpop.f32.mrf.mxu1 }
 0x233   : > { %v471_v1 = vpop.f32.mrf.mxu0 }
 0x235   : > { %1507 = vmatmul.msk.f32.gmra.mxu1 %vm317_vm10, %v2371_v54 }
 0x236   : > { %1472 = vmatmul.msk.f32.gmra.mxu0 %vm317_vm10, %v2371_v54 }
 0x23a   : > { %v643_v17 = vpop.f32.mrf.mxu1 }
 0x23b   : > { %v473_v7 = vpop.f32.mrf.mxu0  ;;  %v1099_v27 = vmul.f32 %v643_v17, %v2202_v21  ;;  %v1155_v19 = vmul.f32 %v643_v17, %v643_v17  ;;  %v1159_v44 = vmul.f32 %v2255_v48, %v643_v17  ;;  %v1163_v47 = vmul.f32 %v2327_v31, %v643_v17 }
 0x23c   : > { %v1035_v16 = vmul.f32 %v473_v7, %v473_v7  ;;  %v1043_v18 = vmul.f32 %v2255_v48, %v473_v7  ;;  %v1047_v11 = vmul.f32 %v2327_v31, %v473_v7  ;;  %v1083_v54 = vmul.f32 %v473_v7, %v2202_v21  ;;  %v827_v21 = vpop.f32.mrf.mxu2 }
 0x23d   : > { %v1091_v40 = vmul.f32 %v2141_v55, %v473_v7  ;;  %v1095_v25 = vmul.f32 %v2171_v61, %v473_v7  ;;  %v1039_v8 = vmul.f32 %v643_v17, %v473_v7  ;;  %v1087_v38 = vmul.f32 %v2200_v20, %v473_v7 }
 0x23e   : > { %v1051_v2 = vadd.f32 %v1035_v16, %v1019_v12  ;;  %v1059_v26 = vadd.f32 %v1043_v18, %v1027_v13  ;;  %v1063_v0 = vadd.f32 %v1047_v11, %v1031_v34  ;;  %v1111_v39 = vsub.f32 %v1083_v54, %v1083_v54 }
 0x23f   : > { %v1119_v35 = vsub.f32 %v1091_v40, %v1103_v6  ;;  %v1123_v56 = vsub.f32 %v1095_v25, %v1107_v37  ;;  %v1055_v46 = vadd.f32 %v1039_v8, %v1023_v9  ;;  %v1115_v50 = vsub.f32 %v1087_v38, %v1099_v27 }
 0x240   : > { %1067 = vst.msk [vmem:[%s2268_s8] sm:$0xff] %vm267_vm7, %v1051_v2  ;;  %v1192_v52 = vmul.f32 %v643_v17, %v2200_v20  ;;  %v1167_v51 = vadd.f32 %v1155_v19, %v1143_v15  ;;  %v1196_v60 = vmul.f32 %v2141_v55, %v643_v17  ;;  %v1171_v1 = vadd.f32 %v1159_v44, %v1147_v49 }
 0x241   : > { %1075 = vst.msk [vmem:[%s2268_s8 + $0x40] sm:$0xff] %vm267_vm7, %v1059_v26  ;;  %v1200_v4 = vmul.f32 %v2171_v61, %v643_v17  ;;  %v1204_v7 = vmul.f32 %v2255_v48, %v2200_v20  ;;  %v1175_v12 = vadd.f32 %v1163_v47, %v1151_v32  ;;  %v1208_v34 = vmul.f32 %v2327_v31, %v2200_v20 }
 0x242   : > { %1079 = vst.msk [vmem:[%s2268_s8 + $0x60] sm:$0xff] %vm267_vm7, %v1063_v0  ;;  %v2500_v43 = vpop.f32.mrf.mxu1  ;;  %v1212_v55 = vsub.f32 %v1192_v52, %v1192_v52  ;;  %v1020_v48 = vmul.f32 %v2210_v24, %v2210_v24  ;;  %v1028_v20 = vmul.f32 %v2149_v57, %v2210_v24  ;;  %v1032_v18 = vmul.f32 %v2178_v63, %v2210_v24  ;;  %v999_v0 = vpop.f32.mrf.mxu3 }
 0x243   : > { %1127 = vst.msk [vmem:[%s2277_s11] sm:$0xff] %vm267_vm7, %v1111_v39  ;;  %v476_v42 = vpop.f32.mrf.mxu0  ;;  %v1216_v61 = vsub.f32 %v1196_v60, %v1204_v7  ;;  %v1220_v16 = vsub.f32 %v1200_v4, %v1208_v34  ;;  %v1104_v8 = vmul.f32 %v2287_v58, %v2210_v24  ;;  %v1108_v39 = vmul.f32 %v2369_v53, %v2210_v24 }
 0x244   : > { %1135 = vst.msk [vmem:[%s2277_s11 + $0x40] sm:$0xff] %vm267_vm7, %v1119_v35  ;;  %v1036_v13 = vmul.f32 %v476_v42, %v476_v42  ;;  %v1044_v14 = vmul.f32 %v2287_v58, %v476_v42  ;;  %v1048_v17 = vmul.f32 %v2369_v53, %v476_v42  ;;  %v1084_v31 = vmul.f32 %v476_v42, %v2210_v24  ;;  %v829_v40 = vpop.f32.mrf.mxu2 }
 0x245   : > { %1139 = vst.msk [vmem:[%s2277_s11 + $0x60] sm:$0xff] %vm267_vm7, %v1123_v56  ;;  %v1092_v54 = vmul.f32 %v2149_v57, %v476_v42  ;;  %v1096_v2 = vmul.f32 %v2178_v63, %v476_v42  ;;  %v1040_v38 = vmul.f32 %v2500_v43, %v476_v42  ;;  %v1088_v27 = vmul.f32 %v2208_v23, %v476_v42 }
 0x246   : > { %1071 = vst.msk [vmem:[%s2268_s8 + $0x20] sm:$0xff] %vm267_vm7, %v1055_v46  ;;  %v1052_v11 = vadd.f32 %v1036_v13, %v1020_v48  ;;  %v1060_v25 = vadd.f32 %v1044_v14, %v1028_v20  ;;  %v1064_v37 = vadd.f32 %v1048_v17, %v1032_v18  ;;  %v1112_v35 = vsub.f32 %v1084_v31, %v1084_v31 }
 0x247   : > { %1131 = vst.msk [vmem:[%s2277_s11 + $0x20] sm:$0xff] %vm267_vm7, %v1115_v50  ;;  %v1100_v9 = vmul.f32 %v2500_v43, %v2210_v24  ;;  %v1120_v19 = vsub.f32 %v1092_v54, %v1104_v8  ;;  %v1024_v56 = vmul.f32 %v2208_v23, %v2210_v24  ;;  %v1156_v44 = vmul.f32 %v2500_v43, %v2500_v43 }
 0x248   : > { %1578 = vst.msk [vmem:[%s2268_s8 + $0x80] sm:$0xff] %vm267_vm7, %v1167_v51  ;;  %v1124_v46 = vsub.f32 %v1096_v2, %v1108_v39  ;;  %v1160_v15 = vmul.f32 %v2287_v58, %v2500_v43  ;;  %v1144_v21 = vmul.f32 %v2208_v23, %v2208_v23  ;;  %v1164_v50 = vmul.f32 %v2369_v53, %v2500_v43 }
 0x249   : > { %1582 = vst.msk [vmem:[%s2268_s8 + $0xa0] sm:$0xff] %vm267_vm7, %v1171_v1  ;;  %v1056_v47 = vadd.f32 %v1040_v38, %v1024_v56  ;;  %v1116_v24 = vsub.f32 %v1088_v27, %v1100_v9  ;;  %v1148_v49 = vmul.f32 %v2149_v57, %v2208_v23  ;;  %v1193_v52 = vmul.f32 %v2500_v43, %v2208_v23 }
 0x24a   : > { %1586 = vst.msk [vmem:[%s2268_s8 + $0xc0] sm:$0xff] %vm267_vm7, %v1175_v12  ;;  %v2539_v6 = vpop.f32.mrf.mxu1  ;;  %v1152_v42 = vmul.f32 %v2178_v63, %v2208_v23  ;;  %v1168_v45 = vadd.f32 %v1156_v44, %v1144_v21  ;;  %v1197_v32 = vmul.f32 %v2149_v57, %v2500_v43  ;;  %v1201_v4 = vmul.f32 %v2178_v63, %v2500_v43  ;;  %v1001_v12 = vpop.f32.mrf.mxu3 }
 0x24b   : > { %1590 = vst.msk [vmem:[%s2277_s11 + $0x80] sm:$0xff] %vm267_vm7, %v1212_v55  ;;  %v2544_v26 = vpop.f32.mrf.mxu0  ;;  %v1172_v1 = vadd.f32 %v1160_v15, %v1148_v49  ;;  %v1205_v13 = vmul.f32 %v2287_v58, %v2208_v23  ;;  %v1209_v55 = vmul.f32 %v2369_v53, %v2208_v23  ;;  %v1213_v63 = vsub.f32 %v1193_v52, %v1193_v52 }
 0x24c   : > { %1594 = vst.msk [vmem:[%s2277_s11 + $0xa0] sm:$0xff] %vm267_vm7, %v1216_v61  ;;  %v831_v60 = vpop.f32.mrf.mxu2  ;;  %v1176_v57 = vadd.f32 %v1164_v50, %v1152_v42  ;;  %v1037_v34 = vmul.f32 %v2544_v26, %v2544_v26  ;;  %v1045_v43 = vmul.f32 %v2307_v10, %v2544_v26  ;;  %v1021_v14 = vmul.f32 %v2218_v29, %v2218_v29 }
 0x24d   : > { %1598 = vst.msk [vmem:[%s2277_s11 + $0xc0] sm:$0xff] %vm267_vm7, %v1220_v16  ;;  %v1217_v58 = vsub.f32 %v1197_v32, %v1205_v13  ;;  %v1049_v61 = vmul.f32 %v2407_v22, %v2544_v26  ;;  %v1221_v23 = vsub.f32 %v1201_v4, %v1209_v55  ;;  %v1029_v53 = vmul.f32 %v2160_v59, %v2218_v29 }
 0x24e   : > { %1068 = vst.msk [vmem:[%s2268_s8 + $0x8] sm:$0xff] %vm267_vm7, %v1052_v11  ;;  %v1085_v48 = vmul.f32 %v2544_v26, %v2218_v29  ;;  %v1033_v17 = vmul.f32 %v2184_v3, %v2218_v29  ;;  %v1053_v16 = vadd.f32 %v1037_v34, %v1021_v14  ;;  %v1093_v20 = vmul.f32 %v2160_v59, %v2544_v26 }
 0x24f   : > { %1076 = vst.msk [vmem:[%s2268_s8 + $0x48] sm:$0xff] %vm267_vm7, %v1060_v25  ;;  %v1061_v31 = vadd.f32 %v1045_v43, %v1029_v53  ;;  %v1097_v18 = vmul.f32 %v2184_v3, %v2544_v26  ;;  %v1105_v11 = vmul.f32 %v2307_v10, %v2218_v29  ;;  %v1041_v40 = vmul.f32 %v2539_v6, %v2544_v26 }
 0x250   : > { %1080 = vst.msk [vmem:[%s2268_s8 + $0x68] sm:$0xff] %vm267_vm7, %v1064_v37  ;;  %v1065_v54 = vadd.f32 %v1049_v61, %v1033_v17  ;;  %v1109_v2 = vmul.f32 %v2407_v22, %v2218_v29  ;;  %v1089_v0 = vmul.f32 %v2216_v28, %v2544_v26  ;;  %v1113_v8 = vsub.f32 %v1085_v48, %v1085_v48 }
 0x251   : > { %1128 = vst.msk [vmem:[%s2277_s11 + $0x8] sm:$0xff] %vm267_vm7, %v1112_v35  ;;  %v1101_v37 = vmul.f32 %v2539_v6, %v2218_v29  ;;  %v1121_v39 = vsub.f32 %v1093_v20, %v1105_v11  ;;  %v1025_v27 = vmul.f32 %v2216_v28, %v2218_v29  ;;  %v1157_v35 = vmul.f32 %v2539_v6, %v2539_v6 }
 0x252   : > { %1136 = vst.msk [vmem:[%s2277_s11 + $0x48] sm:$0xff] %vm267_vm7, %v1120_v19  ;;  %v2586_v51 = vpop.f32.mrf.mxu1  ;;  %v1003_v19 = vpop.f32.mrf.mxu3  ;;  %v1125_v26 = vsub.f32 %v1097_v18, %v1109_v2  ;;  %v1161_v56 = vmul.f32 %v2307_v10, %v2539_v6  ;;  %v1165_v29 = vmul.f32 %v2407_v22, %v2539_v6  ;;  %v1194_v21 = vmul.f32 %v2539_v6, %v2216_v28 }
 0x253   : > { %1140 = vst.msk [vmem:[%s2277_s11 + $0x68] sm:$0xff] %vm267_vm7, %v1124_v46  ;;  %v2592_v7 = vpop.f32.mrf.mxu0  ;;  %v1057_v44 = vadd.f32 %v1041_v40, %v1025_v27  ;;  %v1145_v46 = vmul.f32 %v2216_v28, %v2216_v28  ;;  %v1117_v15 = vsub.f32 %v1089_v0, %v1101_v37  ;;  %v1153_v50 = vmul.f32 %v2184_v3, %v2216_v28 }
 0x254   : > { %1072 = vst.msk [vmem:[%s2268_s8 + $0x28] sm:$0xff] %vm267_vm7, %v1056_v47  ;;  %v833_v9 = vpop.f32.mrf.mxu2  ;;  %v1149_v47 = vmul.f32 %v2160_v59, %v2216_v28  ;;  %v1198_v49 = vmul.f32 %v2160_v59, %v2539_v6  ;;  %v1202_v42 = vmul.f32 %v2184_v3, %v2539_v6  ;;  %v1038_v60 = vmul.f32 %v2592_v7, %v2592_v7 }
 0x255   : > { %1132 = vst.msk [vmem:[%s2277_s11 + $0x28] sm:$0xff] %vm267_vm7, %v1116_v24  ;;  %v1169_v24 = vadd.f32 %v1157_v35, %v1145_v46  ;;  %v1177_v32 = vadd.f32 %v1165_v29, %v1153_v50  ;;  %v1210_v59 = vmul.f32 %v2407_v22, %v2216_v28  ;;  %v1214_v4 = vsub.f32 %v1194_v21, %v1194_v21 }
 0x256   : > { %1579 = vst.msk [vmem:[%s2268_s8 + $0x88] sm:$0xff] %vm267_vm7, %v1168_v45  ;;  %v1173_v52 = vadd.f32 %v1161_v56, %v1149_v47  ;;  %v1206_v45 = vmul.f32 %v2307_v10, %v2216_v28  ;;  %v1046_v3 = vmul.f32 %v2339_v36, %v2592_v7  ;;  %v1022_v12 = vmul.f32 %v2228_v30, %v2228_v30 }
 0x257   : > { %1583 = vst.msk [vmem:[%s2268_s8 + $0xa8] sm:$0xff] %vm267_vm7, %v1172_v1  ;;  %v1050_v13 = vmul.f32 %v2435_v41, %v2592_v7  ;;  %v1222_v22 = vsub.f32 %v1202_v42, %v1210_v59  ;;  %v1030_v34 = vmul.f32 %v2173_v62, %v2228_v30  ;;  %v1086_v55 = vmul.f32 %v2592_v7, %v2228_v30 }
 0x258   : > { %1587 = vst.msk [vmem:[%s2268_s8 + $0xc8] sm:$0xff] %vm267_vm7, %v1176_v57  ;;  %v1218_v6 = vsub.f32 %v1198_v49, %v1206_v45  ;;  %v1054_v43 = vadd.f32 %v1038_v60, %v1022_v12  ;;  %v1098_v61 = vmul.f32 %v2190_v5, %v2592_v7  ;;  %v1042_v48 = vmul.f32 %v2586_v51, %v2592_v7 }
 0x259   : > { %1591 = vst.msk [vmem:[%s2277_s11 + $0x88] sm:$0xff] %vm267_vm7, %v1213_v63  ;;  %v1034_v63 = vmul.f32 %v2190_v5, %v2228_v30  ;;  %v1062_v14 = vadd.f32 %v1046_v3, %v1030_v34  ;;  %v1110_v17 = vmul.f32 %v2435_v41, %v2228_v30  ;;  %v1114_v20 = vsub.f32 %v1086_v55, %v1086_v55 }
 0x25a   : > { %1595 = vst.msk [vmem:[%s2277_s11 + $0xa8] sm:$0xff] %vm267_vm7, %v1217_v58  ;;  %v655_v25 = vpop.f32.mrf.mxu1  ;;  %v1005_v28 = vpop.f32.mrf.mxu3  ;;  %v1094_v58 = vmul.f32 %v2173_v62, %v2592_v7  ;;  %v1026_v11 = vmul.f32 %v2226_v33, %v2228_v30  ;;  %v1150_v27 = vmul.f32 %v2173_v62, %v2226_v33  ;;  %v1195_v35 = vmul.f32 %v2586_v51, %v2226_v33 }
 0x25b   : > { %1599 = vst.msk [vmem:[%s2277_s11 + $0xc8] sm:$0xff] %vm267_vm7, %v1221_v23  ;;  %v485_v38 = vpop.f32.mrf.mxu0  ;;  %v1106_v23 = vmul.f32 %v2339_v36, %v2228_v30  ;;  %v1066_v53 = vadd.f32 %v1050_v13, %v1034_v63  ;;  %v1126_v25 = vsub.f32 %v1098_v61, %v1110_v17  ;;  %v1154_v9 = vmul.f32 %v2190_v5, %v2226_v33 }
 0x25c   : > { %1069 = vst.msk [vmem:[%s2268_s8 + $0x10] sm:$0xff] %vm267_vm7, %v1053_v16  ;;  %v835_v57 = vpop.f32.mrf.mxu2  ;;  %v1090_v16 = vmul.f32 %v2226_v33, %v2592_v7  ;;  %v1162_v7 = vmul.f32 %v2339_v36, %v2586_v51  ;;  %v1058_v0 = vadd.f32 %v1042_v48, %v1026_v11  ;;  %v1207_v46 = vmul.f32 %v2339_v36, %v2226_v33 }
 0x25d   : > { %1077 = vst.msk [vmem:[%s2268_s8 + $0x50] sm:$0xff] %vm267_vm7, %v1061_v31  ;;  %v1102_v31 = vmul.f32 %v2586_v51, %v2228_v30  ;;  %v1122_v18 = vsub.f32 %v1094_v58, %v1106_v23  ;;  %v1166_v30 = vmul.f32 %v2435_v41, %v2586_v51 }
 0x25e   : > { %1081 = vst.msk [vmem:[%s2268_s8 + $0x70] sm:$0xff] %vm267_vm7, %v1065_v54  ;;  %v1158_v54 = vmul.f32 %v2586_v51, %v2586_v51  ;;  %v1174_v56 = vadd.f32 %v1162_v7, %v1150_v27 }
 0x25f   : > { %1129 = vst.msk [vmem:[%s2277_s11 + $0x10] sm:$0xff] %vm267_vm7, %v1113_v8  ;;  %v1146_v8 = vmul.f32 %v2226_v33, %v2226_v33  ;;  %v1178_v29 = vadd.f32 %v1166_v30, %v1154_v9 }
 0x260   : > { %1137 = vst.msk [vmem:[%s2277_s11 + $0x50] sm:$0xff] %vm267_vm7, %v1121_v39  ;;  %v1118_v39 = vsub.f32 %v1090_v16, %v1102_v31 }
 0x261   : > { %1141 = vst.msk [vmem:[%s2277_s11 + $0x70] sm:$0xff] %vm267_vm7, %v1125_v26  ;;  %v1170_v19 = vadd.f32 %v1158_v54, %v1146_v8  ;;  %v1199_v26 = vmul.f32 %v2173_v62, %v2586_v51  ;;  %v1215_v62 = vsub.f32 %v1195_v35, %v1195_v35 }
 0x262   : > { %1073 = vst.msk [vmem:[%s2268_s8 + $0x30] sm:$0xff] %vm267_vm7, %v1057_v44  ;;  %v657_v1 = vpop.f32.mrf.mxu1  ;;  %v1007_v38 = vpop.f32.mrf.mxu3  ;;  %v1203_v44 = vmul.f32 %v2190_v5, %v2586_v51 }
 0x263   : > { %1133 = vst.msk [vmem:[%s2277_s11 + $0x30] sm:$0xff] %vm267_vm7, %v1117_v15  ;;  %v487_v10 = vpop.f32.mrf.mxu0  ;;  %v1211_v15 = vmul.f32 %v2435_v41, %v2226_v33  ;;  %v1219_v47 = vsub.f32 %v1199_v26, %v1207_v46 }
 0x264   : > { %1580 = vst.msk [vmem:[%s2268_s8 + $0x90] sm:$0xff] %vm267_vm7, %v1169_v24  ;;  %v837_v37 = vpop.f32.mrf.mxu2 }
 0x265   : > { %1584 = vst.msk [vmem:[%s2268_s8 + $0xb0] sm:$0xff] %vm267_vm7, %v1173_v52  ;;  %v1223_v5 = vsub.f32 %v1203_v44, %v1211_v15 }
 0x266   : > { %1588 = vst.msk [vmem:[%s2268_s8 + $0xd0] sm:$0xff] %vm267_vm7, %v1177_v32 }
 0x267   : > { %1592 = vst.msk [vmem:[%s2277_s11 + $0x90] sm:$0xff] %vm267_vm7, %v1214_v4 }
 0x268   : > { %1596 = vst.msk [vmem:[%s2277_s11 + $0xb0] sm:$0xff] %vm267_vm7, %v1218_v6 }
 0x269   : > { %1600 = vst.msk [vmem:[%s2277_s11 + $0xd0] sm:$0xff] %vm267_vm7, %v1222_v22 }
 0x26a   : > { %1070 = vst.msk [vmem:[%s2268_s8 + $0x18] sm:$0xff] %vm267_vm7, %v1054_v43  ;;  %v659_v40 = vpop.f32.mrf.mxu1  ;;  %v1009_v36 = vpop.f32.mrf.mxu3 }
 0x26b   : > { %1078 = vst.msk [vmem:[%s2268_s8 + $0x58] sm:$0xff] %vm267_vm7, %v1062_v14  ;;  %v489_v2 = vpop.f32.mrf.mxu0 }
 0x26c   : > { %1082 = vst.msk [vmem:[%s2268_s8 + $0x78] sm:$0xff] %vm267_vm7, %v1066_v53  ;;  %v839_v33 = vpop.f32.mrf.mxu2 }
 0x26d   : > { %1130 = vst.msk [vmem:[%s2277_s11 + $0x18] sm:$0xff] %vm267_vm7, %v1114_v20 }
 0x26e   : > { %1138 = vst.msk [vmem:[%s2277_s11 + $0x58] sm:$0xff] %vm267_vm7, %v1122_v18 }
 0x26f   : > { %1142 = vst.msk [vmem:[%s2277_s11 + $0x78] sm:$0xff] %vm267_vm7, %v1126_v25 }
 0x270   : > { %1074 = vst.msk [vmem:[%s2268_s8 + $0x38] sm:$0xff] %vm267_vm7, %v1058_v0 }
 0x271   : > { %1134 = vst.msk [vmem:[%s2277_s11 + $0x38] sm:$0xff] %vm267_vm7, %v1118_v39 }
 0x272   : > { %1581 = vst.msk [vmem:[%s2268_s8 + $0x98] sm:$0xff] %vm267_vm7, %v1170_v19  ;;  %v661_v21 = vpop.f32.mrf.mxu1  ;;  %v1011_v49 = vpop.f32.mrf.mxu3 }
 0x273   : > { %1585 = vst.msk [vmem:[%s2268_s8 + $0xb8] sm:$0xff] %vm267_vm7, %v1174_v56  ;;  %v491_v51 = vpop.f32.mrf.mxu0 }
 0x274   : > { %1589 = vst.msk [vmem:[%s2268_s8 + $0xd8] sm:$0xff] %vm267_vm7, %v1178_v29  ;;  %v841_v24 = vpop.f32.mrf.mxu2 }
 0x275   : > { %1593 = vst.msk [vmem:[%s2277_s11 + $0x98] sm:$0xff] %vm267_vm7, %v1215_v62 }
 0x276   : > { %1597 = vst.msk [vmem:[%s2277_s11 + $0xb8] sm:$0xff] %vm267_vm7, %v1219_v47 }
 0x277   : > { %1601 = vst.msk [vmem:[%s2277_s11 + $0xd8] sm:$0xff] %vm267_vm7, %v1223_v5 }
 0x27a   : > { %v663_v41 = vpop.f32.mrf.mxu1  ;;  %v1013_v32 = vpop.f32.mrf.mxu3 }
 0x27b   : > { %v493_v50 = vpop.f32.mrf.mxu0 }
 0x27c   : > { %v843_v45 = vpop.f32.mrf.mxu2 }
 0x282   : > { %v665_v52 = vpop.f32.mrf.mxu1  ;;  %v1015_v4 = vpop.f32.mrf.mxu3 }
 0x283   : > { %v495_v42 = vpop.f32.mrf.mxu0 }
 0x284   : > { %v845_v59 = vpop.f32.mrf.mxu2 }
 0x28a   : > { %v667_v60 = vpop.f32.mrf.mxu1  ;;  %v1017_v12 = vpop.f32.mrf.mxu3 }
 0x28b   : > { %v497_v1 = vpop.f32.mrf.mxu0 }
 0x28c   : > { %v847_v6 = vpop.f32.mrf.mxu2 }
 0x292   : > { %v669_v3 = vpop.f32.mrf.mxu1 }
 0x293   : > { %v499_v10 = vpop.f32.mrf.mxu0 }
 0x29a   : > { %v671_v13 = vpop.f32.mrf.mxu1 }
 0x29b   : > { %v501_v57 = vpop.f32.mrf.mxu0 }
 0x2a2   : > { %v673_v28 = vpop.f32.mrf.mxu1 }
 0x2a3   : > { %v503_v22 = vpop.f32.mrf.mxu0 }
 0x2aa   : > { %v675_v34 = vpop.f32.mrf.mxu1 }
 0x2ab   : > { %v505_v55 = vpop.f32.mrf.mxu0 }
 0x2b2   : > { %v677_v63 = vpop.f32.mrf.mxu1 }
 0x2b3   : > { %v507_v43 = vpop.f32.mrf.mxu0 }
 0x2b4 PF: > { %s15_s12 = sadd.s32 1, %s1698_s12  }
 0x2b5   : > { %p12_p7 = scmp.ge.s32.totalorder %s15_s12, 4  }
 0x2b7   :  { %14 = sbr.rel (!%p12_p7) target bundleno = 1 (0x1), region = 84 }
 0x2bc   :  { %1366 = vsyncpa [#allocation3], 1 }
 0x2bd   :  { %1368 = vsyncpa [#allocation3 + $0x1], 1 }

</bundles_post_ra>
